<compile_context>
chip_gen: v7x
topology: tpu7x:2x2x1
jax: 0.10.0
libtpu: 0.0.40
codegen_flags: <defaults>
</compile_context>

<pallas_src>
import math
import jax
import jax.numpy as jnp
from jax.experimental import pallas as pl
from jax.experimental.pallas import tpu as pltpu

# ---------------- config ----------------
NUM_LAYERS = 2
D_MODEL = 32
N_HEADS = 4
D_K = D_MODEL // N_HEADS
D_FF = 64
EPS = 1e-6


# ---------------- fused decoder-block kernel ----------------
def _make_decoder_block_kernel(apply_final_norm: bool):
    def kernel(x_ref, enc_ref, srcm_ref, tgtm_ref,
               ln1a, ln1b, sa_wqkv, sa_bqkv, sa_wo, sa_bo,
               ln2a, ln2b, ca_wqkv, ca_bqkv, ca_wo, ca_bo,
               ln3a, ln3b, ffw1, ffb1, ffw2, ffb2,
               norma, normb,
               o_ref):
        x = x_ref[0]            # (St, D)
        enc = enc_ref[0]        # (Ss, D)
        src_m = srcm_ref[0]     # (St, Ss)
        tgt_m = tgtm_ref[0]     # (St, St)

        def layernorm(z, a_ref, b_ref):
            d = z.shape[-1]
            mean = jnp.mean(z, axis=-1, keepdims=True)
            # torch .std() default is unbiased (divides by D-1)
            var = jnp.sum((z - mean) ** 2, axis=-1, keepdims=True) / (d - 1)
            std = jnp.sqrt(var)
            return a_ref[...] * (z - mean) / (std + EPS) + b_ref[...]

        def mha_out(q, k, v, mask, wo_ref, bo_ref):
            """Multi-head attention + output projection, all in VMEM.

            q: (Sq, D), k/v: (Sk, D), mask: (Sq, Sk).
            concat(heads) @ Wo is computed as sum_h head_h @ Wo[h*dk:(h+1)*dk].
            """
            wo = wo_ref[...]                                   # (D, D)
            scale = jnp.float32(1.0 / math.sqrt(D_K))
            acc = jnp.zeros((q.shape[0], D_MODEL), jnp.float32)
            for h in range(N_HEADS):                           # static unroll
                sl = slice(h * D_K, (h + 1) * D_K)
                qh, kh, vh = q[:, sl], k[:, sl], v[:, sl]      # (S, dk)
                s = jnp.dot(qh, kh.T, preferred_element_type=jnp.float32) * scale
                s = jnp.where(mask == 0, jnp.float32(-1e9), s)
                s = s - jnp.max(s, axis=-1, keepdims=True)
                p = jnp.exp(s)
                p = p * pl.reciprocal(jnp.sum(p, axis=-1, keepdims=True),
                                      approx=True)
                head = jnp.dot(p, vh, preferred_element_type=jnp.float32)
                acc = acc + jnp.dot(head, wo[sl, :],
                                    preferred_element_type=jnp.float32)
            return acc + bo_ref[...]

        # ---- residual 1: self-attention (pre-norm), fused QKV projection ----
        xn = layernorm(x, ln1a, ln1b)
        qkv = jnp.dot(xn, sa_wqkv[...],
                      preferred_element_type=jnp.float32) + sa_bqkv[...]
        q = qkv[:, :D_MODEL]
        k = qkv[:, D_MODEL:2 * D_MODEL]
        v = qkv[:, 2 * D_MODEL:]
        x = x + mha_out(q, k, v, tgt_m, sa_wo, sa_bo)

        # ---- residual 2: cross-attention with encoder output ----
        xn = layernorm(x, ln2a, ln2b)
        ca_w = ca_wqkv[...]                                    # (D, 3D)
        ca_b = ca_bqkv[...]                                    # (1, 3D)
        q = jnp.dot(xn, ca_w[:, :D_MODEL],
                    preferred_element_type=jnp.float32) + ca_b[:, :D_MODEL]
        kv = jnp.dot(enc, ca_w[:, D_MODEL:],
                     preferred_element_type=jnp.float32) + ca_b[:, D_MODEL:]
        k = kv[:, :D_MODEL]
        v = kv[:, D_MODEL:]
        x = x + mha_out(q, k, v, src_m, ca_wo, ca_bo)

        # ---- residual 3: feed-forward (linear -> relu -> linear) ----
        xn = layernorm(x, ln3a, ln3b)
        h1 = jnp.maximum(
            jnp.dot(xn, ffw1[...], preferred_element_type=jnp.float32) + ffb1[...],
            0.0)
        x = x + jnp.dot(h1, ffw2[...],
                        preferred_element_type=jnp.float32) + ffb2[...]

        # ---- final Decoder LayerNormalization fused into the last block ----
        if apply_final_norm:
            x = layernorm(x, norma, normb)

        o_ref[0] = x.astype(o_ref.dtype)

    return kernel


def decoder_block_call(p, x, enc, src_mask, tgt_mask, norm_a, norm_b,
                       apply_final_norm):
    B, St, D = x.shape
    Ss = enc.shape[1]

    weights = [
        p["ln1_a"], p["ln1_b"],
        p["sa_wqkv"], p["sa_bqkv"], p["sa_wo"], p["sa_bo"],
        p["ln2_a"], p["ln2_b"],
        p["ca_wqkv"], p["ca_bqkv"], p["ca_wo"], p["ca_bo"],
        p["ln3_a"], p["ln3_b"],
        p["ff_w1"], p["ff_b1"], p["ff_w2"], p["ff_b2"],
        norm_a, norm_b,
    ]
    # All weights are 2-D; block = full array, same tile for every grid step.
    w_specs = [pl.BlockSpec(w.shape, lambda b: (0, 0)) for w in weights]

    in_specs = [
        pl.BlockSpec((1, St, D), lambda b: (b, 0, 0)),      # x
        pl.BlockSpec((1, Ss, D), lambda b: (b, 0, 0)),      # encoder output
        pl.BlockSpec((1, St, Ss), lambda b: (b, 0, 0)),     # src mask
        pl.BlockSpec((1, St, St), lambda b: (b, 0, 0)),     # tgt mask
    ] + w_specs

    return pl.pallas_call(
        _make_decoder_block_kernel(apply_final_norm),
        out_shape=jax.ShapeDtypeStruct((B, St, D), jnp.float32),
        grid=(B,),
        in_specs=in_specs,
        out_specs=pl.BlockSpec((1, St, D), lambda b: (b, 0, 0)),
        compiler_params=pltpu.CompilerParams(
            dimension_semantics=("parallel",)),   # shard batch across TCs (v7x)
    )(x, enc, src_mask, tgt_mask, *weights)


def decoder_forward(params, x, encoder_output, src_mask, tgt_mask):
    n = len(params["layers"])
    for i, p in enumerate(params["layers"]):
        x = decoder_block_call(
            p, x, encoder_output, src_mask, tgt_mask,
            params["norm_a"], params["norm_b"],
            apply_final_norm=(i == n - 1),
        )
    return x


# ---------------- deterministic parameter init ----------------
def _init_linear(key, din, dout, scale=0.05):
    k1, k2 = jax.random.split(key)
    w = jax.random.normal(k1, (din, dout), jnp.float32) * scale
    b = jax.random.normal(k2, (1, dout), jnp.float32) * scale
    return w, b


def _init_mha(key):
    kq, kk, kv, ko = jax.random.split(key, 4)
    wq, bq = _init_linear(kq, D_MODEL, D_MODEL)
    wk, bk = _init_linear(kk, D_MODEL, D_MODEL)
    wv, bv = _init_linear(kv, D_MODEL, D_MODEL)
    wo, bo = _init_linear(ko, D_MODEL, D_MODEL)
    # Fused QKV weight/bias: one (D, 3D) matmul inside the kernel.
    return (jnp.concatenate([wq, wk, wv], axis=1),
            jnp.concatenate([bq, bk, bv], axis=1),
            wo, bo)


def init_params(key):
    layers = []
    for _ in range(NUM_LAYERS):
        keys = jax.random.split(key, 5)
        key = keys[0]
        sa_wqkv, sa_bqkv, sa_wo, sa_bo = _init_mha(keys[1])
        ca_wqkv, ca_bqkv, ca_wo, ca_bo = _init_mha(keys[2])
        ff_w1, ff_b1 = _init_linear(keys[3], D_MODEL, D_FF)
        ff_w2, ff_b2 = _init_linear(keys[4], D_FF, D_MODEL)
        layers.append(dict(
            sa_wqkv=sa_wqkv, sa_bqkv=sa_bqkv, sa_wo=sa_wo, sa_bo=sa_bo,
            ca_wqkv=ca_wqkv, ca_bqkv=ca_bqkv, ca_wo=ca_wo, ca_bo=ca_bo,
            ff_w1=ff_w1, ff_b1=ff_b1, ff_w2=ff_w2, ff_b2=ff_b2,
            ln1_a=jnp.ones((1, D_MODEL), jnp.float32),
            ln1_b=jnp.zeros((1, D_MODEL), jnp.float32),
            ln2_a=jnp.ones((1, D_MODEL), jnp.float32),
            ln2_b=jnp.zeros((1, D_MODEL), jnp.float32),
            ln3_a=jnp.ones((1, D_MODEL), jnp.float32),
            ln3_b=jnp.zeros((1, D_MODEL), jnp.float32),
        ))
    return dict(
        layers=layers,
        norm_a=jnp.ones((1, D_MODEL), jnp.float32),
        norm_b=jnp.zeros((1, D_MODEL), jnp.float32),
    )


# ---------------- main ----------------
if __name__ == "__main__":
    B, S_TGT, S_SRC = 2, 8, 8
    root = jax.random.PRNGKey(0)
    k_param, k_x, k_enc = jax.random.split(root, 3)

    params = init_params(k_param)
    x = jax.random.normal(k_x, (B, S_TGT, D_MODEL), jnp.float32)
    encoder_output = jax.random.normal(k_enc, (B, S_SRC, D_MODEL), jnp.float32)

    # src mask: all positions visible; tgt mask: causal (lower-triangular)
    src_mask = jnp.ones((B, S_TGT, S_SRC), jnp.float32)
    tgt_mask = jnp.broadcast_to(
        jnp.tril(jnp.ones((S_TGT, S_TGT), jnp.float32)), (B, S_TGT, S_TGT)
    )

    out = decoder_forward(params, x, encoder_output, src_mask, tgt_mask)
    out = jax.block_until_ready(out)
    assert out.shape == (B, S_TGT, D_MODEL) and out.dtype == jnp.float32
    assert bool(jnp.all(jnp.isfinite(out)))
    print("KERNEL_OK")
</pallas_src>

<mosaic_0001>
module attributes {stable_mosaic.version = 11 : i64} {
  func.func @kernel(%arg0: i32, %arg1: memref<1x8x32xf32, #tpu.memory_space<vmem>>, %arg2: memref<1x8x32xf32, #tpu.memory_space<vmem>>, %arg3: memref<1x8x8xf32, #tpu.memory_space<vmem>>, %arg4: memref<1x8x8xf32, #tpu.memory_space<vmem>>, %arg5: memref<1x32xf32, #tpu.memory_space<vmem>>, %arg6: memref<1x32xf32, #tpu.memory_space<vmem>>, %arg7: memref<32x96xf32, #tpu.memory_space<vmem>>, %arg8: memref<1x96xf32, #tpu.memory_space<vmem>>, %arg9: memref<32x32xf32, #tpu.memory_space<vmem>>, %arg10: memref<1x32xf32, #tpu.memory_space<vmem>>, %arg11: memref<1x32xf32, #tpu.memory_space<vmem>>, %arg12: memref<1x32xf32, #tpu.memory_space<vmem>>, %arg13: memref<32x96xf32, #tpu.memory_space<vmem>>, %arg14: memref<1x96xf32, #tpu.memory_space<vmem>>, %arg15: memref<32x32xf32, #tpu.memory_space<vmem>>, %arg16: memref<1x32xf32, #tpu.memory_space<vmem>>, %arg17: memref<1x32xf32, #tpu.memory_space<vmem>>, %arg18: memref<1x32xf32, #tpu.memory_space<vmem>>, %arg19: memref<32x64xf32, #tpu.memory_space<vmem>>, %arg20: memref<1x64xf32, #tpu.memory_space<vmem>>, %arg21: memref<64x32xf32, #tpu.memory_space<vmem>>, %arg22: memref<1x32xf32, #tpu.memory_space<vmem>>, %arg23: memref<1x32xf32, #tpu.memory_space<vmem>>, %arg24: memref<1x32xf32, #tpu.memory_space<vmem>>, %arg25: memref<1x8x32xf32, #tpu.memory_space<vmem>>) attributes {dimension_semantics = [#tpu.dimension_semantics<parallel>], iteration_bounds = array<i64: 2>, scalar_prefetch = 0 : i64, scratch_operands = 0 : i64, tpu.core_type = #tpu.core_type<tc>, window_params = [{transform_indices = @transform_0, window_bounds = array<i64: 1, 8, 32>}, {transform_indices = @transform_1, window_bounds = array<i64: 1, 8, 32>}, {transform_indices = @transform_2, window_bounds = array<i64: 1, 8, 8>}, {transform_indices = @transform_3, window_bounds = array<i64: 1, 8, 8>}, {pipeline_mode = #tpu.pipeline_mode<synchronous>, transform_indices = @transform_4, window_bounds = array<i64: 1, 32>}, {pipeline_mode = #tpu.pipeline_mode<synchronous>, transform_indices = @transform_5, window_bounds = array<i64: 1, 32>}, {pipeline_mode = #tpu.pipeline_mode<synchronous>, transform_indices = @transform_6, window_bounds = array<i64: 32, 96>}, {pipeline_mode = #tpu.pipeline_mode<synchronous>, transform_indices = @transform_7, window_bounds = array<i64: 1, 96>}, {pipeline_mode = #tpu.pipeline_mode<synchronous>, transform_indices = @transform_8, window_bounds = array<i64: 32, 32>}, {pipeline_mode = #tpu.pipeline_mode<synchronous>, transform_indices = @transform_9, window_bounds = array<i64: 1, 32>}, {pipeline_mode = #tpu.pipeline_mode<synchronous>, transform_indices = @transform_10, window_bounds = array<i64: 1, 32>}, {pipeline_mode = #tpu.pipeline_mode<synchronous>, transform_indices = @transform_11, window_bounds = array<i64: 1, 32>}, {pipeline_mode = #tpu.pipeline_mode<synchronous>, transform_indices = @transform_12, window_bounds = array<i64: 32, 96>}, {pipeline_mode = #tpu.pipeline_mode<synchronous>, transform_indices = @transform_13, window_bounds = array<i64: 1, 96>}, {pipeline_mode = #tpu.pipeline_mode<synchronous>, transform_indices = @transform_14, window_bounds = array<i64: 32, 32>}, {pipeline_mode = #tpu.pipeline_mode<synchronous>, transform_indices = @transform_15, window_bounds = array<i64: 1, 32>}, {pipeline_mode = #tpu.pipeline_mode<synchronous>, transform_indices = @transform_16, window_bounds = array<i64: 1, 32>}, {pipeline_mode = #tpu.pipeline_mode<synchronous>, transform_indices = @transform_17, window_bounds = array<i64: 1, 32>}, {pipeline_mode = #tpu.pipeline_mode<synchronous>, transform_indices = @transform_18, window_bounds = array<i64: 32, 64>}, {pipeline_mode = #tpu.pipeline_mode<synchronous>, transform_indices = @transform_19, window_bounds = array<i64: 1, 64>}, {pipeline_mode = #tpu.pipeline_mode<synchronous>, transform_indices = @transform_20, window_bounds = array<i64: 64, 32>}, {pipeline_mode = #tpu.pipeline_mode<synchronous>, transform_indices = @transform_21, window_bounds = array<i64: 1, 32>}, {pipeline_mode = #tpu.pipeline_mode<synchronous>, transform_indices = @transform_22, window_bounds = array<i64: 1, 32>}, {pipeline_mode = #tpu.pipeline_mode<synchronous>, transform_indices = @transform_23, window_bounds = array<i64: 1, 32>}, {transform_indices = @transform_24, window_bounds = array<i64: 1, 8, 32>}]} {
    %c0 = arith.constant 0 : index
    %c0_0 = arith.constant 0 : index
    %c0_1 = arith.constant 0 : index
    %0 = vector.load %arg1[%c0, %c0_0, %c0_1] : memref<1x8x32xf32, #tpu.memory_space<vmem>>, vector<1x8x32xf32>
    %1 = vector.shape_cast %0 : vector<1x8x32xf32> to vector<8x32xf32>
    %c0_2 = arith.constant 0 : index
    %c0_3 = arith.constant 0 : index
    %c0_4 = arith.constant 0 : index
    %2 = vector.load %arg2[%c0_2, %c0_3, %c0_4] : memref<1x8x32xf32, #tpu.memory_space<vmem>>, vector<1x8x32xf32>
    %3 = vector.shape_cast %2 : vector<1x8x32xf32> to vector<8x32xf32>
    %c0_5 = arith.constant 0 : index
    %c0_6 = arith.constant 0 : index
    %c0_7 = arith.constant 0 : index
    %4 = vector.load %arg3[%c0_5, %c0_6, %c0_7] : memref<1x8x8xf32, #tpu.memory_space<vmem>>, vector<1x8x8xf32>
    %5 = vector.shape_cast %4 : vector<1x8x8xf32> to vector<8x8xf32>
    %c0_8 = arith.constant 0 : index
    %c0_9 = arith.constant 0 : index
    %c0_10 = arith.constant 0 : index
    %6 = vector.load %arg4[%c0_8, %c0_9, %c0_10] : memref<1x8x8xf32, #tpu.memory_space<vmem>>, vector<1x8x8xf32>
    %7 = vector.shape_cast %6 : vector<1x8x8xf32> to vector<8x8xf32>
    %cst = arith.constant dense<0.000000e+00> : vector<8xf32>
    %8 = vector.multi_reduction <add>, %1, %cst [1] : vector<8x32xf32> to vector<8xf32>
    %9 = vector.shape_cast %8 : vector<8xf32> to vector<8x1xf32>
    %cst_11 = arith.constant 3.200000e+01 : f32
    %10 = vector.broadcast %cst_11 : f32 to vector<8x1xf32>
    %11 = arith.divf %9, %10 : vector<8x1xf32>
    %12 = vector.broadcast %11 : vector<8x1xf32> to vector<8x32xf32>
    %13 = arith.subf %1, %12 : vector<8x32xf32>
    %14 = arith.mulf %13, %13 : vector<8x32xf32>
    %cst_12 = arith.constant dense<0.000000e+00> : vector<8xf32>
    %15 = vector.multi_reduction <add>, %14, %cst_12 [1] : vector<8x32xf32> to vector<8xf32>
    %16 = vector.shape_cast %15 : vector<8xf32> to vector<8x1xf32>
    %cst_13 = arith.constant 3.100000e+01 : f32
    %17 = vector.broadcast %cst_13 : f32 to vector<8x1xf32>
    %18 = arith.divf %16, %17 : vector<8x1xf32>
    %19 = math.sqrt %18 : vector<8x1xf32>
    %c0_14 = arith.constant 0 : index
    %c0_15 = arith.constant 0 : index
    %20 = vector.load %arg5[%c0_14, %c0_15] : memref<1x32xf32, #tpu.memory_space<vmem>>, vector<1x32xf32>
    %21 = vector.broadcast %11 : vector<8x1xf32> to vector<8x32xf32>
    %22 = arith.subf %1, %21 : vector<8x32xf32>
    %23 = vector.broadcast %20 : vector<1x32xf32> to vector<8x32xf32>
    %24 = arith.mulf %23, %22 : vector<8x32xf32>
    %cst_16 = arith.constant 9.99999997E-7 : f32
    %25 = vector.broadcast %cst_16 : f32 to vector<8x1xf32>
    %26 = arith.addf %19, %25 : vector<8x1xf32>
    %27 = vector.broadcast %26 : vector<8x1xf32> to vector<8x32xf32>
    %28 = arith.divf %24, %27 : vector<8x32xf32>
    %c0_17 = arith.constant 0 : index
    %c0_18 = arith.constant 0 : index
    %29 = vector.load %arg6[%c0_17, %c0_18] : memref<1x32xf32, #tpu.memory_space<vmem>>, vector<1x32xf32>
    %30 = vector.broadcast %29 : vector<1x32xf32> to vector<8x32xf32>
    %31 = arith.addf %28, %30 : vector<8x32xf32>
    %c0_19 = arith.constant 0 : index
    %c0_20 = arith.constant 0 : index
    %32 = vector.load %arg7[%c0_19, %c0_20] : memref<32x96xf32, #tpu.memory_space<vmem>>, vector<32x96xf32>
    %cst_21 = arith.constant dense<0.000000e+00> : vector<8x96xf32>
    %33 = tpu.matmul %31, %32, %cst_21 {dimension_numbers = #tpu.dot_dimension_numbers<[1], [0], [0], [1], [0, 0, 1, 1], [], []>} : vector<8x32xf32>, vector<32x96xf32>, vector<8x96xf32> -> vector<8x96xf32>
    %c0_22 = arith.constant 0 : index
    %c0_23 = arith.constant 0 : index
    %34 = vector.load %arg8[%c0_22, %c0_23] : memref<1x96xf32, #tpu.memory_space<vmem>>, vector<1x96xf32>
    %35 = vector.broadcast %34 : vector<1x96xf32> to vector<8x96xf32>
    %36 = arith.addf %33, %35 : vector<8x96xf32>
    %37 = vector.extract_strided_slice %36 {offsets = [0, 0], sizes = [8, 32], strides = [1, 1]} : vector<8x96xf32> to vector<8x32xf32>
    %38 = vector.extract_strided_slice %36 {offsets = [0, 32], sizes = [8, 32], strides = [1, 1]} : vector<8x96xf32> to vector<8x32xf32>
    %39 = vector.extract_strided_slice %36 {offsets = [0, 64], sizes = [8, 32], strides = [1, 1]} : vector<8x96xf32> to vector<8x32xf32>
    %c0_24 = arith.constant 0 : index
    %c0_25 = arith.constant 0 : index
    %40 = vector.load %arg9[%c0_24, %c0_25] : memref<32x32xf32, #tpu.memory_space<vmem>>, vector<32x32xf32>
    %cst_26 = arith.constant 0.000000e+00 : f32
    %41 = vector.broadcast %cst_26 : f32 to vector<8x32xf32>
    %42 = vector.extract_strided_slice %37 {offsets = [0, 0], sizes = [8, 8], strides = [1, 1]} : vector<8x32xf32> to vector<8x8xf32>
    %43 = vector.extract_strided_slice %38 {offsets = [0, 0], sizes = [8, 8], strides = [1, 1]} : vector<8x32xf32> to vector<8x8xf32>
    %44 = vector.extract_strided_slice %39 {offsets = [0, 0], sizes = [8, 8], strides = [1, 1]} : vector<8x32xf32> to vector<8x8xf32>
    %45 = tpu.transpose %43, [1, 0] : vector<8x8xf32> -> vector<8x8xf32>
    %cst_27 = arith.constant dense<0.000000e+00> : vector<8x8xf32>
    %46 = tpu.matmul %42, %45, %cst_27 {dimension_numbers = #tpu.dot_dimension_numbers<[1], [0], [0], [1], [0, 0, 1, 1], [], []>} : vector<8x8xf32>, vector<8x8xf32>, vector<8x8xf32> -> vector<8x8xf32>
    %cst_28 = arith.constant 0.353553385 : f32
    %47 = vector.broadcast %cst_28 : f32 to vector<8x8xf32>
    %48 = arith.mulf %46, %47 : vector<8x8xf32>
    %cst_29 = arith.constant 0.000000e+00 : f32
    %49 = vector.broadcast %cst_29 : f32 to vector<8x8xf32>
    %50 = arith.cmpf oeq, %7, %49 : vector<8x8xf32>
    %cst_30 = arith.constant -1.000000e+09 : f32
    %51 = vector.broadcast %cst_30 : f32 to vector<8x8xf32>
    %52 = arith.select %50, %51, %48 : vector<8x8xi1>, vector<8x8xf32>
    %cst_31 = arith.constant dense<0xFF800000> : vector<8xf32>
    %53 = vector.multi_reduction <maximumf>, %52, %cst_31 [1] : vector<8x8xf32> to vector<8xf32>
    %54 = vector.shape_cast %53 : vector<8xf32> to vector<8x1xf32>
    %55 = vector.broadcast %54 : vector<8x1xf32> to vector<8x8xf32>
    %56 = arith.subf %52, %55 : vector<8x8xf32>
    %57 = math.exp %56 : vector<8x8xf32>
    %cst_32 = arith.constant dense<0.000000e+00> : vector<8xf32>
    %58 = vector.multi_reduction <add>, %57, %cst_32 [1] : vector<8x8xf32> to vector<8xf32>
    %59 = vector.shape_cast %58 : vector<8xf32> to vector<8x1xf32>
    %60 = tpu.reciprocal %59 {approx = true} : vector<8x1xf32> -> vector<8x1xf32>
    %61 = vector.broadcast %60 : vector<8x1xf32> to vector<8x8xf32>
    %62 = arith.mulf %57, %61 : vector<8x8xf32>
    %cst_33 = arith.constant dense<0.000000e+00> : vector<8x8xf32>
    %63 = tpu.matmul %62, %44, %cst_33 {dimension_numbers = #tpu.dot_dimension_numbers<[1], [0], [0], [1], [0, 0, 1, 1], [], []>} : vector<8x8xf32>, vector<8x8xf32>, vector<8x8xf32> -> vector<8x8xf32>
    %64 = vector.extract_strided_slice %40 {offsets = [0, 0], sizes = [8, 32], strides = [1, 1]} : vector<32x32xf32> to vector<8x32xf32>
    %cst_34 = arith.constant dense<0.000000e+00> : vector<8x32xf32>
    %65 = tpu.matmul %63, %64, %cst_34 {dimension_numbers = #tpu.dot_dimension_numbers<[1], [0], [0], [1], [0, 0, 1, 1], [], []>} : vector<8x8xf32>, vector<8x32xf32>, vector<8x32xf32> -> vector<8x32xf32>
    %66 = arith.addf %41, %65 : vector<8x32xf32>
    %67 = vector.extract_strided_slice %37 {offsets = [0, 8], sizes = [8, 8], strides = [1, 1]} : vector<8x32xf32> to vector<8x8xf32>
    %68 = vector.extract_strided_slice %38 {offsets = [0, 8], sizes = [8, 8], strides = [1, 1]} : vector<8x32xf32> to vector<8x8xf32>
    %69 = vector.extract_strided_slice %39 {offsets = [0, 8], sizes = [8, 8], strides = [1, 1]} : vector<8x32xf32> to vector<8x8xf32>
    %70 = tpu.transpose %68, [1, 0] : vector<8x8xf32> -> vector<8x8xf32>
    %cst_35 = arith.constant dense<0.000000e+00> : vector<8x8xf32>
    %71 = tpu.matmul %67, %70, %cst_35 {dimension_numbers = #tpu.dot_dimension_numbers<[1], [0], [0], [1], [0, 0, 1, 1], [], []>} : vector<8x8xf32>, vector<8x8xf32>, vector<8x8xf32> -> vector<8x8xf32>
    %cst_36 = arith.constant 0.353553385 : f32
    %72 = vector.broadcast %cst_36 : f32 to vector<8x8xf32>
    %73 = arith.mulf %71, %72 : vector<8x8xf32>
    %cst_37 = arith.constant 0.000000e+00 : f32
    %74 = vector.broadcast %cst_37 : f32 to vector<8x8xf32>
    %75 = arith.cmpf oeq, %7, %74 : vector<8x8xf32>
    %cst_38 = arith.constant -1.000000e+09 : f32
    %76 = vector.broadcast %cst_38 : f32 to vector<8x8xf32>
    %77 = arith.select %75, %76, %73 : vector<8x8xi1>, vector<8x8xf32>
    %cst_39 = arith.constant dense<0xFF800000> : vector<8xf32>
    %78 = vector.multi_reduction <maximumf>, %77, %cst_39 [1] : vector<8x8xf32> to vector<8xf32>
    %79 = vector.shape_cast %78 : vector<8xf32> to vector<8x1xf32>
    %80 = vector.broadcast %79 : vector<8x1xf32> to vector<8x8xf32>
    %81 = arith.subf %77, %80 : vector<8x8xf32>
    %82 = math.exp %81 : vector<8x8xf32>
    %cst_40 = arith.constant dense<0.000000e+00> : vector<8xf32>
    %83 = vector.multi_reduction <add>, %82, %cst_40 [1] : vector<8x8xf32> to vector<8xf32>
    %84 = vector.shape_cast %83 : vector<8xf32> to vector<8x1xf32>
    %85 = tpu.reciprocal %84 {approx = true} : vector<8x1xf32> -> vector<8x1xf32>
    %86 = vector.broadcast %85 : vector<8x1xf32> to vector<8x8xf32>
    %87 = arith.mulf %82, %86 : vector<8x8xf32>
    %cst_41 = arith.constant dense<0.000000e+00> : vector<8x8xf32>
    %88 = tpu.matmul %87, %69, %cst_41 {dimension_numbers = #tpu.dot_dimension_numbers<[1], [0], [0], [1], [0, 0, 1, 1], [], []>} : vector<8x8xf32>, vector<8x8xf32>, vector<8x8xf32> -> vector<8x8xf32>
    %89 = vector.extract_strided_slice %40 {offsets = [8, 0], sizes = [8, 32], strides = [1, 1]} : vector<32x32xf32> to vector<8x32xf32>
    %cst_42 = arith.constant dense<0.000000e+00> : vector<8x32xf32>
    %90 = tpu.matmul %88, %89, %cst_42 {dimension_numbers = #tpu.dot_dimension_numbers<[1], [0], [0], [1], [0, 0, 1, 1], [], []>} : vector<8x8xf32>, vector<8x32xf32>, vector<8x32xf32> -> vector<8x32xf32>
    %91 = arith.addf %66, %90 : vector<8x32xf32>
    %92 = vector.extract_strided_slice %37 {offsets = [0, 16], sizes = [8, 8], strides = [1, 1]} : vector<8x32xf32> to vector<8x8xf32>
    %93 = vector.extract_strided_slice %38 {offsets = [0, 16], sizes = [8, 8], strides = [1, 1]} : vector<8x32xf32> to vector<8x8xf32>
    %94 = vector.extract_strided_slice %39 {offsets = [0, 16], sizes = [8, 8], strides = [1, 1]} : vector<8x32xf32> to vector<8x8xf32>
    %95 = tpu.transpose %93, [1, 0] : vector<8x8xf32> -> vector<8x8xf32>
    %cst_43 = arith.constant dense<0.000000e+00> : vector<8x8xf32>
    %96 = tpu.matmul %92, %95, %cst_43 {dimension_numbers = #tpu.dot_dimension_numbers<[1], [0], [0], [1], [0, 0, 1, 1], [], []>} : vector<8x8xf32>, vector<8x8xf32>, vector<8x8xf32> -> vector<8x8xf32>
    %cst_44 = arith.constant 0.353553385 : f32
    %97 = vector.broadcast %cst_44 : f32 to vector<8x8xf32>
    %98 = arith.mulf %96, %97 : vector<8x8xf32>
    %cst_45 = arith.constant 0.000000e+00 : f32
    %99 = vector.broadcast %cst_45 : f32 to vector<8x8xf32>
    %100 = arith.cmpf oeq, %7, %99 : vector<8x8xf32>
    %cst_46 = arith.constant -1.000000e+09 : f32
    %101 = vector.broadcast %cst_46 : f32 to vector<8x8xf32>
    %102 = arith.select %100, %101, %98 : vector<8x8xi1>, vector<8x8xf32>
    %cst_47 = arith.constant dense<0xFF800000> : vector<8xf32>
    %103 = vector.multi_reduction <maximumf>, %102, %cst_47 [1] : vector<8x8xf32> to vector<8xf32>
    %104 = vector.shape_cast %103 : vector<8xf32> to vector<8x1xf32>
    %105 = vector.broadcast %104 : vector<8x1xf32> to vector<8x8xf32>
    %106 = arith.subf %102, %105 : vector<8x8xf32>
    %107 = math.exp %106 : vector<8x8xf32>
    %cst_48 = arith.constant dense<0.000000e+00> : vector<8xf32>
    %108 = vector.multi_reduction <add>, %107, %cst_48 [1] : vector<8x8xf32> to vector<8xf32>
    %109 = vector.shape_cast %108 : vector<8xf32> to vector<8x1xf32>
    %110 = tpu.reciprocal %109 {approx = true} : vector<8x1xf32> -> vector<8x1xf32>
    %111 = vector.broadcast %110 : vector<8x1xf32> to vector<8x8xf32>
    %112 = arith.mulf %107, %111 : vector<8x8xf32>
    %cst_49 = arith.constant dense<0.000000e+00> : vector<8x8xf32>
    %113 = tpu.matmul %112, %94, %cst_49 {dimension_numbers = #tpu.dot_dimension_numbers<[1], [0], [0], [1], [0, 0, 1, 1], [], []>} : vector<8x8xf32>, vector<8x8xf32>, vector<8x8xf32> -> vector<8x8xf32>
    %114 = vector.extract_strided_slice %40 {offsets = [16, 0], sizes = [8, 32], strides = [1, 1]} : vector<32x32xf32> to vector<8x32xf32>
    %cst_50 = arith.constant dense<0.000000e+00> : vector<8x32xf32>
    %115 = tpu.matmul %113, %114, %cst_50 {dimension_numbers = #tpu.dot_dimension_numbers<[1], [0], [0], [1], [0, 0, 1, 1], [], []>} : vector<8x8xf32>, vector<8x32xf32>, vector<8x32xf32> -> vector<8x32xf32>
    %116 = arith.addf %91, %115 : vector<8x32xf32>
    %117 = vector.extract_strided_slice %37 {offsets = [0, 24], sizes = [8, 8], strides = [1, 1]} : vector<8x32xf32> to vector<8x8xf32>
    %118 = vector.extract_strided_slice %38 {offsets = [0, 24], sizes = [8, 8], strides = [1, 1]} : vector<8x32xf32> to vector<8x8xf32>
    %119 = vector.extract_strided_slice %39 {offsets = [0, 24], sizes = [8, 8], strides = [1, 1]} : vector<8x32xf32> to vector<8x8xf32>
    %120 = tpu.transpose %118, [1, 0] : vector<8x8xf32> -> vector<8x8xf32>
    %cst_51 = arith.constant dense<0.000000e+00> : vector<8x8xf32>
    %121 = tpu.matmul %117, %120, %cst_51 {dimension_numbers = #tpu.dot_dimension_numbers<[1], [0], [0], [1], [0, 0, 1, 1], [], []>} : vector<8x8xf32>, vector<8x8xf32>, vector<8x8xf32> -> vector<8x8xf32>
    %cst_52 = arith.constant 0.353553385 : f32
    %122 = vector.broadcast %cst_52 : f32 to vector<8x8xf32>
    %123 = arith.mulf %121, %122 : vector<8x8xf32>
    %cst_53 = arith.constant 0.000000e+00 : f32
    %124 = vector.broadcast %cst_53 : f32 to vector<8x8xf32>
    %125 = arith.cmpf oeq, %7, %124 : vector<8x8xf32>
    %cst_54 = arith.constant -1.000000e+09 : f32
    %126 = vector.broadcast %cst_54 : f32 to vector<8x8xf32>
    %127 = arith.select %125, %126, %123 : vector<8x8xi1>, vector<8x8xf32>
    %cst_55 = arith.constant dense<0xFF800000> : vector<8xf32>
    %128 = vector.multi_reduction <maximumf>, %127, %cst_55 [1] : vector<8x8xf32> to vector<8xf32>
    %129 = vector.shape_cast %128 : vector<8xf32> to vector<8x1xf32>
    %130 = vector.broadcast %129 : vector<8x1xf32> to vector<8x8xf32>
    %131 = arith.subf %127, %130 : vector<8x8xf32>
    %132 = math.exp %131 : vector<8x8xf32>
    %cst_56 = arith.constant dense<0.000000e+00> : vector<8xf32>
    %133 = vector.multi_reduction <add>, %132, %cst_56 [1] : vector<8x8xf32> to vector<8xf32>
    %134 = vector.shape_cast %133 : vector<8xf32> to vector<8x1xf32>
    %135 = tpu.reciprocal %134 {approx = true} : vector<8x1xf32> -> vector<8x1xf32>
    %136 = vector.broadcast %135 : vector<8x1xf32> to vector<8x8xf32>
    %137 = arith.mulf %132, %136 : vector<8x8xf32>
    %cst_57 = arith.constant dense<0.000000e+00> : vector<8x8xf32>
    %138 = tpu.matmul %137, %119, %cst_57 {dimension_numbers = #tpu.dot_dimension_numbers<[1], [0], [0], [1], [0, 0, 1, 1], [], []>} : vector<8x8xf32>, vector<8x8xf32>, vector<8x8xf32> -> vector<8x8xf32>
    %139 = vector.extract_strided_slice %40 {offsets = [24, 0], sizes = [8, 32], strides = [1, 1]} : vector<32x32xf32> to vector<8x32xf32>
    %cst_58 = arith.constant dense<0.000000e+00> : vector<8x32xf32>
    %140 = tpu.matmul %138, %139, %cst_58 {dimension_numbers = #tpu.dot_dimension_numbers<[1], [0], [0], [1], [0, 0, 1, 1], [], []>} : vector<8x8xf32>, vector<8x32xf32>, vector<8x32xf32> -> vector<8x32xf32>
    %141 = arith.addf %116, %140 : vector<8x32xf32>
    %c0_59 = arith.constant 0 : index
    %c0_60 = arith.constant 0 : index
    %142 = vector.load %arg10[%c0_59, %c0_60] : memref<1x32xf32, #tpu.memory_space<vmem>>, vector<1x32xf32>
    %143 = vector.broadcast %142 : vector<1x32xf32> to vector<8x32xf32>
    %144 = arith.addf %141, %143 : vector<8x32xf32>
    %145 = arith.addf %1, %144 : vector<8x32xf32>
    %cst_61 = arith.constant dense<0.000000e+00> : vector<8xf32>
    %146 = vector.multi_reduction <add>, %145, %cst_61 [1] : vector<8x32xf32> to vector<8xf32>
    %147 = vector.shape_cast %146 : vector<8xf32> to vector<8x1xf32>
    %cst_62 = arith.constant 3.200000e+01 : f32
    %148 = vector.broadcast %cst_62 : f32 to vector<8x1xf32>
    %149 = arith.divf %147, %148 : vector<8x1xf32>
    %150 = vector.broadcast %149 : vector<8x1xf32> to vector<8x32xf32>
    %151 = arith.subf %145, %150 : vector<8x32xf32>
    %152 = arith.mulf %151, %151 : vector<8x32xf32>
    %cst_63 = arith.constant dense<0.000000e+00> : vector<8xf32>
    %153 = vector.multi_reduction <add>, %152, %cst_63 [1] : vector<8x32xf32> to vector<8xf32>
    %154 = vector.shape_cast %153 : vector<8xf32> to vector<8x1xf32>
    %cst_64 = arith.constant 3.100000e+01 : f32
    %155 = vector.broadcast %cst_64 : f32 to vector<8x1xf32>
    %156 = arith.divf %154, %155 : vector<8x1xf32>
    %157 = math.sqrt %156 : vector<8x1xf32>
    %c0_65 = arith.constant 0 : index
    %c0_66 = arith.constant 0 : index
    %158 = vector.load %arg11[%c0_65, %c0_66] : memref<1x32xf32, #tpu.memory_space<vmem>>, vector<1x32xf32>
    %159 = vector.broadcast %149 : vector<8x1xf32> to vector<8x32xf32>
    %160 = arith.subf %145, %159 : vector<8x32xf32>
    %161 = vector.broadcast %158 : vector<1x32xf32> to vector<8x32xf32>
    %162 = arith.mulf %161, %160 : vector<8x32xf32>
    %cst_67 = arith.constant 9.99999997E-7 : f32
    %163 = vector.broadcast %cst_67 : f32 to vector<8x1xf32>
    %164 = arith.addf %157, %163 : vector<8x1xf32>
    %165 = vector.broadcast %164 : vector<8x1xf32> to vector<8x32xf32>
    %166 = arith.divf %162, %165 : vector<8x32xf32>
    %c0_68 = arith.constant 0 : index
    %c0_69 = arith.constant 0 : index
    %167 = vector.load %arg12[%c0_68, %c0_69] : memref<1x32xf32, #tpu.memory_space<vmem>>, vector<1x32xf32>
    %168 = vector.broadcast %167 : vector<1x32xf32> to vector<8x32xf32>
    %169 = arith.addf %166, %168 : vector<8x32xf32>
    %c0_70 = arith.constant 0 : index
    %c0_71 = arith.constant 0 : index
    %170 = vector.load %arg13[%c0_70, %c0_71] : memref<32x96xf32, #tpu.memory_space<vmem>>, vector<32x96xf32>
    %c0_72 = arith.constant 0 : index
    %c0_73 = arith.constant 0 : index
    %171 = vector.load %arg14[%c0_72, %c0_73] : memref<1x96xf32, #tpu.memory_space<vmem>>, vector<1x96xf32>
    %172 = vector.extract_strided_slice %170 {offsets = [0, 0], sizes = [32, 32], strides = [1, 1]} : vector<32x96xf32> to vector<32x32xf32>
    %cst_74 = arith.constant dense<0.000000e+00> : vector<8x32xf32>
    %173 = tpu.matmul %169, %172, %cst_74 {dimension_numbers = #tpu.dot_dimension_numbers<[1], [0], [0], [1], [0, 0, 1, 1], [], []>} : vector<8x32xf32>, vector<32x32xf32>, vector<8x32xf32> -> vector<8x32xf32>
    %174 = vector.extract_strided_slice %171 {offsets = [0, 0], sizes = [1, 32], strides = [1, 1]} : vector<1x96xf32> to vector<1x32xf32>
    %175 = vector.broadcast %174 : vector<1x32xf32> to vector<8x32xf32>
    %176 = arith.addf %173, %175 : vector<8x32xf32>
    %177 = vector.extract_strided_slice %170 {offsets = [0, 32], sizes = [32, 64], strides = [1, 1]} : vector<32x96xf32> to vector<32x64xf32>
    %cst_75 = arith.constant dense<0.000000e+00> : vector<8x64xf32>
    %178 = tpu.matmul %3, %177, %cst_75 {dimension_numbers = #tpu.dot_dimension_numbers<[1], [0], [0], [1], [0, 0, 1, 1], [], []>} : vector<8x32xf32>, vector<32x64xf32>, vector<8x64xf32> -> vector<8x64xf32>
    %179 = vector.extract_strided_slice %171 {offsets = [0, 32], sizes = [1, 64], strides = [1, 1]} : vector<1x96xf32> to vector<1x64xf32>
    %180 = vector.broadcast %179 : vector<1x64xf32> to vector<8x64xf32>
    %181 = arith.addf %178, %180 : vector<8x64xf32>
    %182 = vector.extract_strided_slice %181 {offsets = [0, 0], sizes = [8, 32], strides = [1, 1]} : vector<8x64xf32> to vector<8x32xf32>
    %183 = vector.extract_strided_slice %181 {offsets = [0, 32], sizes = [8, 32], strides = [1, 1]} : vector<8x64xf32> to vector<8x32xf32>
    %c0_76 = arith.constant 0 : index
    %c0_77 = arith.constant 0 : index
    %184 = vector.load %arg15[%c0_76, %c0_77] : memref<32x32xf32, #tpu.memory_space<vmem>>, vector<32x32xf32>
    %cst_78 = arith.constant 0.000000e+00 : f32
    %185 = vector.broadcast %cst_78 : f32 to vector<8x32xf32>
    %186 = vector.extract_strided_slice %176 {offsets = [0, 0], sizes = [8, 8], strides = [1, 1]} : vector<8x32xf32> to vector<8x8xf32>
    %187 = vector.extract_strided_slice %182 {offsets = [0, 0], sizes = [8, 8], strides = [1, 1]} : vector<8x32xf32> to vector<8x8xf32>
    %188 = vector.extract_strided_slice %183 {offsets = [0, 0], sizes = [8, 8], strides = [1, 1]} : vector<8x32xf32> to vector<8x8xf32>
    %189 = tpu.transpose %187, [1, 0] : vector<8x8xf32> -> vector<8x8xf32>
    %cst_79 = arith.constant dense<0.000000e+00> : vector<8x8xf32>
    %190 = tpu.matmul %186, %189, %cst_79 {dimension_numbers = #tpu.dot_dimension_numbers<[1], [0], [0], [1], [0, 0, 1, 1], [], []>} : vector<8x8xf32>, vector<8x8xf32>, vector<8x8xf32> -> vector<8x8xf32>
    %cst_80 = arith.constant 0.353553385 : f32
    %191 = vector.broadcast %cst_80 : f32 to vector<8x8xf32>
    %192 = arith.mulf %190, %191 : vector<8x8xf32>
    %cst_81 = arith.constant 0.000000e+00 : f32
    %193 = vector.broadcast %cst_81 : f32 to vector<8x8xf32>
    %194 = arith.cmpf oeq, %5, %193 : vector<8x8xf32>
    %cst_82 = arith.constant -1.000000e+09 : f32
    %195 = vector.broadcast %cst_82 : f32 to vector<8x8xf32>
    %196 = arith.select %194, %195, %192 : vector<8x8xi1>, vector<8x8xf32>
    %cst_83 = arith.constant dense<0xFF800000> : vector<8xf32>
    %197 = vector.multi_reduction <maximumf>, %196, %cst_83 [1] : vector<8x8xf32> to vector<8xf32>
    %198 = vector.shape_cast %197 : vector<8xf32> to vector<8x1xf32>
    %199 = vector.broadcast %198 : vector<8x1xf32> to vector<8x8xf32>
    %200 = arith.subf %196, %199 : vector<8x8xf32>
    %201 = math.exp %200 : vector<8x8xf32>
    %cst_84 = arith.constant dense<0.000000e+00> : vector<8xf32>
    %202 = vector.multi_reduction <add>, %201, %cst_84 [1] : vector<8x8xf32> to vector<8xf32>
    %203 = vector.shape_cast %202 : vector<8xf32> to vector<8x1xf32>
    %204 = tpu.reciprocal %203 {approx = true} : vector<8x1xf32> -> vector<8x1xf32>
    %205 = vector.broadcast %204 : vector<8x1xf32> to vector<8x8xf32>
    %206 = arith.mulf %201, %205 : vector<8x8xf32>
    %cst_85 = arith.constant dense<0.000000e+00> : vector<8x8xf32>
    %207 = tpu.matmul %206, %188, %cst_85 {dimension_numbers = #tpu.dot_dimension_numbers<[1], [0], [0], [1], [0, 0, 1, 1], [], []>} : vector<8x8xf32>, vector<8x8xf32>, vector<8x8xf32> -> vector<8x8xf32>
    %208 = vector.extract_strided_slice %184 {offsets = [0, 0], sizes = [8, 32], strides = [1, 1]} : vector<32x32xf32> to vector<8x32xf32>
    %cst_86 = arith.constant dense<0.000000e+00> : vector<8x32xf32>
    %209 = tpu.matmul %207, %208, %cst_86 {dimension_numbers = #tpu.dot_dimension_numbers<[1], [0], [0], [1], [0, 0, 1, 1], [], []>} : vector<8x8xf32>, vector<8x32xf32>, vector<8x32xf32> -> vector<8x32xf32>
    %210 = arith.addf %185, %209 : vector<8x32xf32>
    %211 = vector.extract_strided_slice %176 {offsets = [0, 8], sizes = [8, 8], strides = [1, 1]} : vector<8x32xf32> to vector<8x8xf32>
    %212 = vector.extract_strided_slice %182 {offsets = [0, 8], sizes = [8, 8], strides = [1, 1]} : vector<8x32xf32> to vector<8x8xf32>
    %213 = vector.extract_strided_slice %183 {offsets = [0, 8], sizes = [8, 8], strides = [1, 1]} : vector<8x32xf32> to vector<8x8xf32>
    %214 = tpu.transpose %212, [1, 0] : vector<8x8xf32> -> vector<8x8xf32>
    %cst_87 = arith.constant dense<0.000000e+00> : vector<8x8xf32>
    %215 = tpu.matmul %211, %214, %cst_87 {dimension_numbers = #tpu.dot_dimension_numbers<[1], [0], [0], [1], [0, 0, 1, 1], [], []>} : vector<8x8xf32>, vector<8x8xf32>, vector<8x8xf32> -> vector<8x8xf32>
    %cst_88 = arith.constant 0.353553385 : f32
    %216 = vector.broadcast %cst_88 : f32 to vector<8x8xf32>
    %217 = arith.mulf %215, %216 : vector<8x8xf32>
    %cst_89 = arith.constant 0.000000e+00 : f32
    %218 = vector.broadcast %cst_89 : f32 to vector<8x8xf32>
    %219 = arith.cmpf oeq, %5, %218 : vector<8x8xf32>
    %cst_90 = arith.constant -1.000000e+09 : f32
    %220 = vector.broadcast %cst_90 : f32 to vector<8x8xf32>
    %221 = arith.select %219, %220, %217 : vector<8x8xi1>, vector<8x8xf32>
    %cst_91 = arith.constant dense<0xFF800000> : vector<8xf32>
    %222 = vector.multi_reduction <maximumf>, %221, %cst_91 [1] : vector<8x8xf32> to vector<8xf32>
    %223 = vector.shape_cast %222 : vector<8xf32> to vector<8x1xf32>
    %224 = vector.broadcast %223 : vector<8x1xf32> to vector<8x8xf32>
    %225 = arith.subf %221, %224 : vector<8x8xf32>
    %226 = math.exp %225 : vector<8x8xf32>
    %cst_92 = arith.constant dense<0.000000e+00> : vector<8xf32>
    %227 = vector.multi_reduction <add>, %226, %cst_92 [1] : vector<8x8xf32> to vector<8xf32>
    %228 = vector.shape_cast %227 : vector<8xf32> to vector<8x1xf32>
    %229 = tpu.reciprocal %228 {approx = true} : vector<8x1xf32> -> vector<8x1xf32>
    %230 = vector.broadcast %229 : vector<8x1xf32> to vector<8x8xf32>
    %231 = arith.mulf %226, %230 : vector<8x8xf32>
    %cst_93 = arith.constant dense<0.000000e+00> : vector<8x8xf32>
    %232 = tpu.matmul %231, %213, %cst_93 {dimension_numbers = #tpu.dot_dimension_numbers<[1], [0], [0], [1], [0, 0, 1, 1], [], []>} : vector<8x8xf32>, vector<8x8xf32>, vector<8x8xf32> -> vector<8x8xf32>
    %233 = vector.extract_strided_slice %184 {offsets = [8, 0], sizes = [8, 32], strides = [1, 1]} : vector<32x32xf32> to vector<8x32xf32>
    %cst_94 = arith.constant dense<0.000000e+00> : vector<8x32xf32>
    %234 = tpu.matmul %232, %233, %cst_94 {dimension_numbers = #tpu.dot_dimension_numbers<[1], [0], [0], [1], [0, 0, 1, 1], [], []>} : vector<8x8xf32>, vector<8x32xf32>, vector<8x32xf32> -> vector<8x32xf32>
    %235 = arith.addf %210, %234 : vector<8x32xf32>
    %236 = vector.extract_strided_slice %176 {offsets = [0, 16], sizes = [8, 8], strides = [1, 1]} : vector<8x32xf32> to vector<8x8xf32>
    %237 = vector.extract_strided_slice %182 {offsets = [0, 16], sizes = [8, 8], strides = [1, 1]} : vector<8x32xf32> to vector<8x8xf32>
    %238 = vector.extract_strided_slice %183 {offsets = [0, 16], sizes = [8, 8], strides = [1, 1]} : vector<8x32xf32> to vector<8x8xf32>
    %239 = tpu.transpose %237, [1, 0] : vector<8x8xf32> -> vector<8x8xf32>
    %cst_95 = arith.constant dense<0.000000e+00> : vector<8x8xf32>
    %240 = tpu.matmul %236, %239, %cst_95 {dimension_numbers = #tpu.dot_dimension_numbers<[1], [0], [0], [1], [0, 0, 1, 1], [], []>} : vector<8x8xf32>, vector<8x8xf32>, vector<8x8xf32> -> vector<8x8xf32>
    %cst_96 = arith.constant 0.353553385 : f32
    %241 = vector.broadcast %cst_96 : f32 to vector<8x8xf32>
    %242 = arith.mulf %240, %241 : vector<8x8xf32>
    %cst_97 = arith.constant 0.000000e+00 : f32
    %243 = vector.broadcast %cst_97 : f32 to vector<8x8xf32>
    %244 = arith.cmpf oeq, %5, %243 : vector<8x8xf32>
    %cst_98 = arith.constant -1.000000e+09 : f32
    %245 = vector.broadcast %cst_98 : f32 to vector<8x8xf32>
    %246 = arith.select %244, %245, %242 : vector<8x8xi1>, vector<8x8xf32>
    %cst_99 = arith.constant dense<0xFF800000> : vector<8xf32>
    %247 = vector.multi_reduction <maximumf>, %246, %cst_99 [1] : vector<8x8xf32> to vector<8xf32>
    %248 = vector.shape_cast %247 : vector<8xf32> to vector<8x1xf32>
    %249 = vector.broadcast %248 : vector<8x1xf32> to vector<8x8xf32>
    %250 = arith.subf %246, %249 : vector<8x8xf32>
    %251 = math.exp %250 : vector<8x8xf32>
    %cst_100 = arith.constant dense<0.000000e+00> : vector<8xf32>
    %252 = vector.multi_reduction <add>, %251, %cst_100 [1] : vector<8x8xf32> to vector<8xf32>
    %253 = vector.shape_cast %252 : vector<8xf32> to vector<8x1xf32>
    %254 = tpu.reciprocal %253 {approx = true} : vector<8x1xf32> -> vector<8x1xf32>
    %255 = vector.broadcast %254 : vector<8x1xf32> to vector<8x8xf32>
    %256 = arith.mulf %251, %255 : vector<8x8xf32>
    %cst_101 = arith.constant dense<0.000000e+00> : vector<8x8xf32>
    %257 = tpu.matmul %256, %238, %cst_101 {dimension_numbers = #tpu.dot_dimension_numbers<[1], [0], [0], [1], [0, 0, 1, 1], [], []>} : vector<8x8xf32>, vector<8x8xf32>, vector<8x8xf32> -> vector<8x8xf32>
    %258 = vector.extract_strided_slice %184 {offsets = [16, 0], sizes = [8, 32], strides = [1, 1]} : vector<32x32xf32> to vector<8x32xf32>
    %cst_102 = arith.constant dense<0.000000e+00> : vector<8x32xf32>
    %259 = tpu.matmul %257, %258, %cst_102 {dimension_numbers = #tpu.dot_dimension_numbers<[1], [0], [0], [1], [0, 0, 1, 1], [], []>} : vector<8x8xf32>, vector<8x32xf32>, vector<8x32xf32> -> vector<8x32xf32>
    %260 = arith.addf %235, %259 : vector<8x32xf32>
    %261 = vector.extract_strided_slice %176 {offsets = [0, 24], sizes = [8, 8], strides = [1, 1]} : vector<8x32xf32> to vector<8x8xf32>
    %262 = vector.extract_strided_slice %182 {offsets = [0, 24], sizes = [8, 8], strides = [1, 1]} : vector<8x32xf32> to vector<8x8xf32>
    %263 = vector.extract_strided_slice %183 {offsets = [0, 24], sizes = [8, 8], strides = [1, 1]} : vector<8x32xf32> to vector<8x8xf32>
    %264 = tpu.transpose %262, [1, 0] : vector<8x8xf32> -> vector<8x8xf32>
    %cst_103 = arith.constant dense<0.000000e+00> : vector<8x8xf32>
    %265 = tpu.matmul %261, %264, %cst_103 {dimension_numbers = #tpu.dot_dimension_numbers<[1], [0], [0], [1], [0, 0, 1, 1], [], []>} : vector<8x8xf32>, vector<8x8xf32>, vector<8x8xf32> -> vector<8x8xf32>
    %cst_104 = arith.constant 0.353553385 : f32
    %266 = vector.broadcast %cst_104 : f32 to vector<8x8xf32>
    %267 = arith.mulf %265, %266 : vector<8x8xf32>
    %cst_105 = arith.constant 0.000000e+00 : f32
    %268 = vector.broadcast %cst_105 : f32 to vector<8x8xf32>
    %269 = arith.cmpf oeq, %5, %268 : vector<8x8xf32>
    %cst_106 = arith.constant -1.000000e+09 : f32
    %270 = vector.broadcast %cst_106 : f32 to vector<8x8xf32>
    %271 = arith.select %269, %270, %267 : vector<8x8xi1>, vector<8x8xf32>
    %cst_107 = arith.constant dense<0xFF800000> : vector<8xf32>
    %272 = vector.multi_reduction <maximumf>, %271, %cst_107 [1] : vector<8x8xf32> to vector<8xf32>
    %273 = vector.shape_cast %272 : vector<8xf32> to vector<8x1xf32>
    %274 = vector.broadcast %273 : vector<8x1xf32> to vector<8x8xf32>
    %275 = arith.subf %271, %274 : vector<8x8xf32>
    %276 = math.exp %275 : vector<8x8xf32>
    %cst_108 = arith.constant dense<0.000000e+00> : vector<8xf32>
    %277 = vector.multi_reduction <add>, %276, %cst_108 [1] : vector<8x8xf32> to vector<8xf32>
    %278 = vector.shape_cast %277 : vector<8xf32> to vector<8x1xf32>
    %279 = tpu.reciprocal %278 {approx = true} : vector<8x1xf32> -> vector<8x1xf32>
    %280 = vector.broadcast %279 : vector<8x1xf32> to vector<8x8xf32>
    %281 = arith.mulf %276, %280 : vector<8x8xf32>
    %cst_109 = arith.constant dense<0.000000e+00> : vector<8x8xf32>
    %282 = tpu.matmul %281, %263, %cst_109 {dimension_numbers = #tpu.dot_dimension_numbers<[1], [0], [0], [1], [0, 0, 1, 1], [], []>} : vector<8x8xf32>, vector<8x8xf32>, vector<8x8xf32> -> vector<8x8xf32>
    %283 = vector.extract_strided_slice %184 {offsets = [24, 0], sizes = [8, 32], strides = [1, 1]} : vector<32x32xf32> to vector<8x32xf32>
    %cst_110 = arith.constant dense<0.000000e+00> : vector<8x32xf32>
    %284 = tpu.matmul %282, %283, %cst_110 {dimension_numbers = #tpu.dot_dimension_numbers<[1], [0], [0], [1], [0, 0, 1, 1], [], []>} : vector<8x8xf32>, vector<8x32xf32>, vector<8x32xf32> -> vector<8x32xf32>
    %285 = arith.addf %260, %284 : vector<8x32xf32>
    %c0_111 = arith.constant 0 : index
    %c0_112 = arith.constant 0 : index
    %286 = vector.load %arg16[%c0_111, %c0_112] : memref<1x32xf32, #tpu.memory_space<vmem>>, vector<1x32xf32>
    %287 = vector.broadcast %286 : vector<1x32xf32> to vector<8x32xf32>
    %288 = arith.addf %285, %287 : vector<8x32xf32>
    %289 = arith.addf %145, %288 : vector<8x32xf32>
    %cst_113 = arith.constant dense<0.000000e+00> : vector<8xf32>
    %290 = vector.multi_reduction <add>, %289, %cst_113 [1] : vector<8x32xf32> to vector<8xf32>
    %291 = vector.shape_cast %290 : vector<8xf32> to vector<8x1xf32>
    %cst_114 = arith.constant 3.200000e+01 : f32
    %292 = vector.broadcast %cst_114 : f32 to vector<8x1xf32>
    %293 = arith.divf %291, %292 : vector<8x1xf32>
    %294 = vector.broadcast %293 : vector<8x1xf32> to vector<8x32xf32>
    %295 = arith.subf %289, %294 : vector<8x32xf32>
    %296 = arith.mulf %295, %295 : vector<8x32xf32>
    %cst_115 = arith.constant dense<0.000000e+00> : vector<8xf32>
    %297 = vector.multi_reduction <add>, %296, %cst_115 [1] : vector<8x32xf32> to vector<8xf32>
    %298 = vector.shape_cast %297 : vector<8xf32> to vector<8x1xf32>
    %cst_116 = arith.constant 3.100000e+01 : f32
    %299 = vector.broadcast %cst_116 : f32 to vector<8x1xf32>
    %300 = arith.divf %298, %299 : vector<8x1xf32>
    %301 = math.sqrt %300 : vector<8x1xf32>
    %c0_117 = arith.constant 0 : index
    %c0_118 = arith.constant 0 : index
    %302 = vector.load %arg17[%c0_117, %c0_118] : memref<1x32xf32, #tpu.memory_space<vmem>>, vector<1x32xf32>
    %303 = vector.broadcast %293 : vector<8x1xf32> to vector<8x32xf32>
    %304 = arith.subf %289, %303 : vector<8x32xf32>
    %305 = vector.broadcast %302 : vector<1x32xf32> to vector<8x32xf32>
    %306 = arith.mulf %305, %304 : vector<8x32xf32>
    %cst_119 = arith.constant 9.99999997E-7 : f32
    %307 = vector.broadcast %cst_119 : f32 to vector<8x1xf32>
    %308 = arith.addf %301, %307 : vector<8x1xf32>
    %309 = vector.broadcast %308 : vector<8x1xf32> to vector<8x32xf32>
    %310 = arith.divf %306, %309 : vector<8x32xf32>
    %c0_120 = arith.constant 0 : index
    %c0_121 = arith.constant 0 : index
    %311 = vector.load %arg18[%c0_120, %c0_121] : memref<1x32xf32, #tpu.memory_space<vmem>>, vector<1x32xf32>
    %312 = vector.broadcast %311 : vector<1x32xf32> to vector<8x32xf32>
    %313 = arith.addf %310, %312 : vector<8x32xf32>
    %c0_122 = arith.constant 0 : index
    %c0_123 = arith.constant 0 : index
    %314 = vector.load %arg19[%c0_122, %c0_123] : memref<32x64xf32, #tpu.memory_space<vmem>>, vector<32x64xf32>
    %cst_124 = arith.constant dense<0.000000e+00> : vector<8x64xf32>
    %315 = tpu.matmul %313, %314, %cst_124 {dimension_numbers = #tpu.dot_dimension_numbers<[1], [0], [0], [1], [0, 0, 1, 1], [], []>} : vector<8x32xf32>, vector<32x64xf32>, vector<8x64xf32> -> vector<8x64xf32>
    %c0_125 = arith.constant 0 : index
    %c0_126 = arith.constant 0 : index
    %316 = vector.load %arg20[%c0_125, %c0_126] : memref<1x64xf32, #tpu.memory_space<vmem>>, vector<1x64xf32>
    %317 = vector.broadcast %316 : vector<1x64xf32> to vector<8x64xf32>
    %318 = arith.addf %315, %317 : vector<8x64xf32>
    %cst_127 = arith.constant 0.000000e+00 : f32
    %319 = vector.broadcast %cst_127 : f32 to vector<8x64xf32>
    %320 = arith.maximumf %318, %319 : vector<8x64xf32>
    %c0_128 = arith.constant 0 : index
    %c0_129 = arith.constant 0 : index
    %321 = vector.load %arg21[%c0_128, %c0_129] : memref<64x32xf32, #tpu.memory_space<vmem>>, vector<64x32xf32>
    %cst_130 = arith.constant dense<0.000000e+00> : vector<8x32xf32>
    %322 = tpu.matmul %320, %321, %cst_130 {dimension_numbers = #tpu.dot_dimension_numbers<[1], [0], [0], [1], [0, 0, 1, 1], [], []>} : vector<8x64xf32>, vector<64x32xf32>, vector<8x32xf32> -> vector<8x32xf32>
    %323 = arith.addf %289, %322 : vector<8x32xf32>
    %c0_131 = arith.constant 0 : index
    %c0_132 = arith.constant 0 : index
    %324 = vector.load %arg22[%c0_131, %c0_132] : memref<1x32xf32, #tpu.memory_space<vmem>>, vector<1x32xf32>
    %325 = vector.broadcast %324 : vector<1x32xf32> to vector<8x32xf32>
    %326 = arith.addf %323, %325 : vector<8x32xf32>
    %c0_133 = arith.constant 0 : index
    %c0_134 = arith.constant 0 : index
    %c0_135 = arith.constant 0 : index
    %327 = vector.load %arg25[%c0_133, %c0_134, %c0_135] : memref<1x8x32xf32, #tpu.memory_space<vmem>>, vector<1x8x32xf32>
    %328 = vector.shape_cast %327 : vector<1x8x32xf32> to vector<8x32xf32>
    %329 = vector.shape_cast %326 : vector<8x32xf32> to vector<1x8x32xf32>
    tpu.vector_store %arg25[%c0_133, %c0_134, %c0_135], %329 {strides = array<i32>} : memref<1x8x32xf32, #tpu.memory_space<vmem>>, vector<1x8x32xf32>,
    return
  }
  func.func @transform_0(%arg0: i32) -> (i32, i32, i32) {
    %c0_i32 = arith.constant 0 : i32
    %c0_i32_0 = arith.constant 0 : i32
    %c0_i32_1 = arith.constant 0 : i32
    return %arg0, %c0_i32, %c0_i32_0 : i32, i32, i32
  }
  func.func @transform_1(%arg0: i32) -> (i32, i32, i32) {
    %c0_i32 = arith.constant 0 : i32
    %c0_i32_0 = arith.constant 0 : i32
    %c0_i32_1 = arith.constant 0 : i32
    return %arg0, %c0_i32, %c0_i32_0 : i32, i32, i32
  }
  func.func @transform_2(%arg0: i32) -> (i32, i32, i32) {
    %c0_i32 = arith.constant 0 : i32
    %c0_i32_0 = arith.constant 0 : i32
    %c0_i32_1 = arith.constant 0 : i32
    return %arg0, %c0_i32, %c0_i32_0 : i32, i32, i32
  }
  func.func @transform_3(%arg0: i32) -> (i32, i32, i32) {
    %c0_i32 = arith.constant 0 : i32
    %c0_i32_0 = arith.constant 0 : i32
    %c0_i32_1 = arith.constant 0 : i32
    return %arg0, %c0_i32, %c0_i32_0 : i32, i32, i32
  }
  func.func @transform_4(%arg0: i32) -> (i32, i32) {
    %c0_i32 = arith.constant 0 : i32
    %c0_i32_0 = arith.constant 0 : i32
    %c0_i32_1 = arith.constant 0 : i32
    return %c0_i32, %c0_i32_0 : i32, i32
  }
  func.func @transform_5(%arg0: i32) -> (i32, i32) {
    %c0_i32 = arith.constant 0 : i32
    %c0_i32_0 = arith.constant 0 : i32
    %c0_i32_1 = arith.constant 0 : i32
    return %c0_i32, %c0_i32_0 : i32, i32
  }
  func.func @transform_6(%arg0: i32) -> (i32, i32) {
    %c0_i32 = arith.constant 0 : i32
    %c0_i32_0 = arith.constant 0 : i32
    %c0_i32_1 = arith.constant 0 : i32
    return %c0_i32, %c0_i32_0 : i32, i32
  }
  func.func @transform_7(%arg0: i32) -> (i32, i32) {
    %c0_i32 = arith.constant 0 : i32
    %c0_i32_0 = arith.constant 0 : i32
    %c0_i32_1 = arith.constant 0 : i32
    return %c0_i32, %c0_i32_0 : i32, i32
  }
  func.func @transform_8(%arg0: i32) -> (i32, i32) {
    %c0_i32 = arith.constant 0 : i32
    %c0_i32_0 = arith.constant 0 : i32
    %c0_i32_1 = arith.constant 0 : i32
    return %c0_i32, %c0_i32_0 : i32, i32
  }
  func.func @transform_9(%arg0: i32) -> (i32, i32) {
    %c0_i32 = arith.constant 0 : i32
    %c0_i32_0 = arith.constant 0 : i32
    %c0_i32_1 = arith.constant 0 : i32
    return %c0_i32, %c0_i32_0 : i32, i32
  }
  func.func @transform_10(%arg0: i32) -> (i32, i32) {
    %c0_i32 = arith.constant 0 : i32
    %c0_i32_0 = arith.constant 0 : i32
    %c0_i32_1 = arith.constant 0 : i32
    return %c0_i32, %c0_i32_0 : i32, i32
  }
  func.func @transform_11(%arg0: i32) -> (i32, i32) {
    %c0_i32 = arith.constant 0 : i32
    %c0_i32_0 = arith.constant 0 : i32
    %c0_i32_1 = arith.constant 0 : i32
    return %c0_i32, %c0_i32_0 : i32, i32
  }
  func.func @transform_12(%arg0: i32) -> (i32, i32) {
    %c0_i32 = arith.constant 0 : i32
    %c0_i32_0 = arith.constant 0 : i32
    %c0_i32_1 = arith.constant 0 : i32
    return %c0_i32, %c0_i32_0 : i32, i32
  }
  func.func @transform_13(%arg0: i32) -> (i32, i32) {
    %c0_i32 = arith.constant 0 : i32
    %c0_i32_0 = arith.constant 0 : i32
    %c0_i32_1 = arith.constant 0 : i32
    return %c0_i32, %c0_i32_0 : i32, i32
  }
  func.func @transform_14(%arg0: i32) -> (i32, i32) {
    %c0_i32 = arith.constant 0 : i32
    %c0_i32_0 = arith.constant 0 : i32
    %c0_i32_1 = arith.constant 0 : i32
    return %c0_i32, %c0_i32_0 : i32, i32
  }
  func.func @transform_15(%arg0: i32) -> (i32, i32) {
    %c0_i32 = arith.constant 0 : i32
    %c0_i32_0 = arith.constant 0 : i32
    %c0_i32_1 = arith.constant 0 : i32
    return %c0_i32, %c0_i32_0 : i32, i32
  }
  func.func @transform_16(%arg0: i32) -> (i32, i32) {
    %c0_i32 = arith.constant 0 : i32
    %c0_i32_0 = arith.constant 0 : i32
    %c0_i32_1 = arith.constant 0 : i32
    return %c0_i32, %c0_i32_0 : i32, i32
  }
  func.func @transform_17(%arg0: i32) -> (i32, i32) {
    %c0_i32 = arith.constant 0 : i32
    %c0_i32_0 = arith.constant 0 : i32
    %c0_i32_1 = arith.constant 0 : i32
    return %c0_i32, %c0_i32_0 : i32, i32
  }
  func.func @transform_18(%arg0: i32) -> (i32, i32) {
    %c0_i32 = arith.constant 0 : i32
    %c0_i32_0 = arith.constant 0 : i32
    %c0_i32_1 = arith.constant 0 : i32
    return %c0_i32, %c0_i32_0 : i32, i32
  }
  func.func @transform_19(%arg0: i32) -> (i32, i32) {
    %c0_i32 = arith.constant 0 : i32
    %c0_i32_0 = arith.constant 0 : i32
    %c0_i32_1 = arith.constant 0 : i32
    return %c0_i32, %c0_i32_0 : i32, i32
  }
  func.func @transform_20(%arg0: i32) -> (i32, i32) {
    %c0_i32 = arith.constant 0 : i32
    %c0_i32_0 = arith.constant 0 : i32
    %c0_i32_1 = arith.constant 0 : i32
    return %c0_i32, %c0_i32_0 : i32, i32
  }
  func.func @transform_21(%arg0: i32) -> (i32, i32) {
    %c0_i32 = arith.constant 0 : i32
    %c0_i32_0 = arith.constant 0 : i32
    %c0_i32_1 = arith.constant 0 : i32
    return %c0_i32, %c0_i32_0 : i32, i32
  }
  func.func @transform_22(%arg0: i32) -> (i32, i32) {
    %c0_i32 = arith.constant 0 : i32
    %c0_i32_0 = arith.constant 0 : i32
    %c0_i32_1 = arith.constant 0 : i32
    return %c0_i32, %c0_i32_0 : i32, i32
  }
  func.func @transform_23(%arg0: i32) -> (i32, i32) {
    %c0_i32 = arith.constant 0 : i32
    %c0_i32_0 = arith.constant 0 : i32
    %c0_i32_1 = arith.constant 0 : i32
    return %c0_i32, %c0_i32_0 : i32, i32
  }
  func.func @transform_24(%arg0: i32) -> (i32, i32, i32) {
    %c0_i32 = arith.constant 0 : i32
    %c0_i32_0 = arith.constant 0 : i32
    %c0_i32_1 = arith.constant 0 : i32
    return %arg0, %c0_i32, %c0_i32_0 : i32, i32, i32
  }
}

</mosaic_0001>

<bundles_post_ra>
// kernel: tpu_custom_call.1
= control target key start
LH: loop header
LB: loop body
LE: loop exit
PB: predicated region body
PF: predicated region fallthrough
CT: control target
= control target key end

     0   :  { %s5926_s0 = inlined_call_operand.hbm [shape: f32[2,8,32], index: 0, kind: input, shape index: {}]   ;;  %s5927_s1 = inlined_call_operand.hbm [shape: f32[2,8,32], index: 1, kind: input, shape index: {}]   ;;  %s5928_s2 = inlined_call_operand.hbm [shape: f32[2,8,8], index: 2, kind: input, shape index: {}]   ;;  %s5929_s3 = inlined_call_operand.hbm [shape: f32[2,8,8], index: 3, kind: input, shape index: {}]   ;;  %s5930_s4 = inlined_call_operand.hbm [shape: f32[1,32], index: 4, kind: input, shape index: {}]   ;;  %s5931_s5 = inlined_call_operand.hbm [shape: f32[1,32], index: 5, kind: input, shape index: {}]   ;;  %s5932_s6 = inlined_call_operand.vmem [shape: f32[32,96], index: 6, kind: input, shape index: {}]   ;;  %s5933_s7 = inlined_call_operand.hbm [shape: f32[1,96], index: 7, kind: input, shape index: {}]   ;;  %s5934_s8 = inlined_call_operand.vmem [shape: f32[32,32], index: 8, kind: input, shape index: {}]   ;;  %s5935_s9 = inlined_call_operand.hbm [shape: f32[1,32], index: 9, kind: input, shape index: {}]   ;;  %s5936_s10 = inlined_call_operand.hbm [shape: f32[1,32], index: 10, kind: input, shape index: {}]   ;;  %s5937_s11 = inlined_call_operand.hbm [shape: f32[1,32], index: 11, kind: input, shape index: {}]   ;;  %s5938_s12 = inlined_call_operand.vmem [shape: f32[32,96], index: 12, kind: input, shape index: {}]   ;;  %s5939_s13 = inlined_call_operand.hbm [shape: f32[1,96], index: 13, kind: input, shape index: {}]   ;;  %s5940_s14 = inlined_call_operand.vmem [shape: f32[32,32], index: 14, kind: input, shape index: {}]   ;;  %s5941_s15 = inlined_call_operand.hbm [shape: f32[1,32], index: 15, kind: input, shape index: {}]   ;;  %s5942_s16 = inlined_call_operand.hbm [shape: f32[1,32], index: 16, kind: input, shape index: {}]   ;;  %s5943_s17 = inlined_call_operand.hbm [shape: f32[1,32], index: 17, kind: input, shape index: {}]   ;;  %s5944_s18 = inlined_call_operand.hbm [shape: f32[32,64], index: 18, kind: input, shape index: {}]   ;;  %s5945_s19 = inlined_call_operand.vmem [shape: f32[1,64], index: 19, kind: input, shape index: {}]   ;;  %s5946_s20 = inlined_call_operand.vmem [shape: f32[64,32], index: 20, kind: input, shape index: {}]   ;;  %s5947_s21 = inlined_call_operand.vmem [shape: f32[1,32], index: 21, kind: input, shape index: {}]   ;;  %s5948_s22 = inlined_call_operand.vmem [shape: f32[1,32], index: 22, kind: input, shape index: {}]   ;;  %s5949_s23 = inlined_call_operand.vmem [shape: f32[1,32], index: 23, kind: input, shape index: {}]   ;;  %s5950_s24 = inlined_call_operand.hbm [shape: f32[2,8,32], index: 24, kind: output, shape index: {}]  }
   0x1   :  { %5991 = sst [smem:[#allocation42_spill]] %s5926_s0 }
   0x2   :  { %5992 = sst [smem:[#allocation43_spill]] %s5927_s1 }
   0x3   :  { %5993 = sst [smem:[#allocation44_spill]] %s5928_s2 }
   0x4   :  { %5994 = sst [smem:[#allocation45_spill]] %s5929_s3 }
   0x5   :  { %5995 = sst [smem:[#allocation46_spill]] %s5930_s4 }
   0x6   :  { %5996 = sst [smem:[#allocation47_spill]] %s5931_s5 }
   0x7   :  { %5997 = sst [smem:[#allocation48_spill]] %s5932_s6 }
   0x8   :  { %5998 = sst [smem:[#allocation49_spill]] %s5933_s7 }
   0x9   :  { %5999 = sst [smem:[#allocation50_spill]] %s5934_s8 }
   0xa   :  { %6000 = sst [smem:[#allocation51_spill]] %s5935_s9 }
   0xb   :  { %6001 = sst [smem:[#allocation52_spill]] %s5937_s11 }
   0xc   :  { %6002 = sst [smem:[#allocation53_spill]] %s5938_s12 }
   0xd   :  { %6003 = sst [smem:[#allocation54_spill]] %s5940_s14 }
   0xe   :  { %6004 = sst [smem:[#allocation55_spill]] %s5941_s15 }
   0xf   :  { %6005 = sst [smem:[#allocation56_spill]] %s5943_s17 }
  0x10   :  { %6006 = sst [smem:[#allocation57_spill]] %s5945_s19 }
  0x11   :  { %6007 = sst [smem:[#allocation58_spill]] %s5946_s20 }
  0x12   :  { %6008 = sst [smem:[#allocation59_spill]] %s5947_s21 }
  0x13   :  { %6009 = sst [smem:[#allocation60_spill]] %s5950_s24 }
  0x14   :  { %29 = vsyncpa [#allocation3], 0 }
  0x15   :  { %31 = vsyncpa [#allocation3 + $0x1], 0 }
  0x16   :  { %32 = vsyncpa [#allocation6], 0 }
  0x17   :  { %34 = vsyncpa [#allocation6 + $0x1], 0 }
  0x18   :  { %35 = vsyncpa [#allocation9], 0 }
  0x19   :  { %37 = vsyncpa [#allocation9 + $0x1], 0 }
  0x1a   :  { %38 = vsyncpa [#allocation12], 0 }
  0x1b   :  { %39 = vsyncpa [#allocation15], 0 }
  0x1c   :  { %40 = vsyncpa [#allocation18], 0 }
  0x1d   :  { %41 = vsyncpa [#allocation21], 0 }
  0x1e   :  { %42 = vsyncpa [#allocation24], 0 }
  0x1f   :  { %43 = vsyncpa [#allocation4], 0 }
  0x20   :  { %45 = vsyncpa [#allocation4 + $0x1], 0  ;;  %s5071_s22 = smov 0   ;;  %s5073_s5 = smov 0  }
  0x21   :  { %s5075_s23 = smov 0   ;;  %s5077_s26 = smov 0  }
  0x22 LB: > { %6010 = sst [smem:[#allocation37_spill]] %s4900_s22  ;;  %s4914_s27 = smov [#allocation10]   ;;  %s4912_s26 = sphi %s5077_s26, %s6074_s26   ;;  %s4908_s23 = sphi %s5075_s23, %s6078_s23   ;;  %s4904_s5 = sphi %s5073_s5, %s6077_s5   ;;  %s4900_s22 = sphi %s5071_s22, %s6076_s22  }
  0x23   : > { %s619_s28 = sshll.u32 %s4914_s27, 4  ;;  %s5092_s6 = sadd.s32 4294967295, %s4912_s26   ;;  %s5097_s28 = int_to_ptr.vmem [resolvable:$true] %s619_s28 }
  0x24   : > { %p3757_p0 = scmp.ge.s32.totalorder %s4912_s26, 1  ;;  %p5964_p1 = scmp.eq.s32.totalorder %s5092_s6, 0 }
  0x25   : > { %p606_p2 = scmp.lt.s32.totalorder %s4912_s26, 3  ;;  %s4915_s29 = smov [#allocation11]  }
  0x26   : > { %s630_s0 = sshll.u32 %s4915_s29, 4  ;;  %s4916_s7 = smov [#allocation14]   ;;  %s5106_s0 = int_to_ptr.vmem [resolvable:$true] %s630_s0 }
  0x27   : > { %p5099_p3 = pnand %p3757_p0, %p606_p2  ;;  %s658_s30 = sshll.u32 %s4916_s7, 4  ;;  %s5114_s30 = int_to_ptr.vmem [resolvable:$true] %s658_s30 }
  0x28   : > { %s4917_s25 = smov [#allocation17]   ;;  %s6013_s27 = sld [smem:[#allocation46_spill]] }
  0x29   : > { %s6011_s2 = scalar_select %p5099_p3, 1, 0 }
  0x2a   : > { %p4198_p5 = pneg %p5099_p3  ;;  %s5116_s8 = sshll.u32 %s4917_s25, 4  ;;  %s681_s8 = int_to_ptr.vmem [resolvable:$true] %s5116_s8 }
  0x2c   : > { %p5110_p6 = pnand %p4198_p5, %p5964_p1 }
  0x2e   : > { %s6012_s3 = scalar_select %p5110_p6, 1, 0 }
  0x2f   : > { %s4386_s24 = scalar_lea.hbm %s6013_s27, 16  ;;  %p5126_p8 = pneg %p5110_p6 }
  0x30   : > { %p4387_p7 = scmp.ne.s32.totalorder %s6013_s27, %s4386_s24  ;;  %p4393_p11 = scmp.lt.u32.totalorder %s4386_s24, %s6013_s27 }
  0x31   : > { %s6014_s7 = scalar_select %p5126_p8, 1, 0 }
  0x32   : > { %p4389_p9 = pnand %p5126_p8, %p4387_p7 }
  0x34   : > { %p4390_p10 = pneg %p4389_p9 }
  0x36   : > { %p4395_p12 = pnand %p4393_p11, %p4390_p10 }
  0x38   : > { %4398 = shalt.err (!%p4395_p12)
}
  0x39   : > { %s4399_s21 = scalar_lea.vmem %s5097_s28, 16  ;;  %s4406_s4 = scalar_lea.vmem %s5097_s28, 32 }
  0x3a   : > { %p4400_p13 = scmp.ne.s32.totalorder %s5097_s28, %s4399_s21  ;;  %p4407_p5 = scmp.lt.s32.totalorder %s5097_s28, %s5097_s28 }
  0x3b   : > { %p4408_p7 = scmp.lt.s32.totalorder %s4406_s4, %s4399_s21 }
  0x3c   : > { %p4402_p0 = pnand %p4400_p13, %p5126_p8 }
  0x3d   : > { %p4409_p9 = por %p4408_p7, %p4407_p5 }
  0x3e   : > { %p4403_p2 = pneg %p4402_p0 }
  0x40   : > { %p4410_p4 = pnand %p4409_p9, %p4403_p2 }
  0x42   : > { %4413 = shalt.err (!%p4410_p4)
}
  0x43   : > { %4201 = dma.hbm_to_vmem [thread:$0]  (!%p5110_p6), %s6013_s27, 16, %s5097_s28, [#allocation9]  }
  0x44   : > { %s6015_s25 = sld [smem:[#allocation47_spill]] }
  0x4a   : > { %s4414_s20 = scalar_lea.hbm %s6015_s25, 16 }
  0x4b   : > { %p4415_p10 = scmp.ne.s32.totalorder %s6015_s25, %s4414_s20  ;;  %p4421_p4 = scmp.lt.u32.totalorder %s4414_s20, %s6015_s25 }
  0x4d   : > { %p4417_p11 = pnand %p4415_p10, %p5126_p8 }
  0x4f   : > { %p4418_p12 = pneg %p4417_p11 }
  0x51   : > { %p4423_p13 = pnand %p4421_p4, %p4418_p12 }
  0x53   : > { %4426 = shalt.err (!%p4423_p13)
}
  0x54   : > { %s4427_s28 = scalar_lea.vmem %s5106_s0, 16  ;;  %s4434_s12 = scalar_lea.vmem %s5106_s0, 32 }
  0x55   : > { %p4428_p0 = scmp.ne.s32.totalorder %s5106_s0, %s4427_s28  ;;  %p4435_p7 = scmp.lt.s32.totalorder %s5106_s0, %s5106_s0 }
  0x56   : > { %p4436_p9 = scmp.lt.s32.totalorder %s4434_s12, %s4427_s28 }
  0x57   : > { %p4430_p2 = pnand %p4428_p0, %p5126_p8 }
  0x58   : > { %p4437_p10 = por %p4436_p9, %p4435_p7 }
  0x59   : > { %p4431_p5 = pneg %p4430_p2 }
  0x5b   : > { %p4438_p11 = pnand %p4437_p10, %p4431_p5 }
  0x5d   : > { %4441 = shalt.err (!%p4438_p11)
}
  0x5e   : > { %4204 = dma.hbm_to_vmem [thread:$0]  (!%p5110_p6), %s6015_s25, 16, %s5106_s0, [#allocation12]  }
  0x5f   : > { %s6016_s9 = sld [smem:[#allocation51_spill]] }
  0x65   : > { %s4442_s1 = scalar_lea.hbm %s6016_s9, 16 }
  0x66   : > { %p4443_p12 = scmp.ne.s32.totalorder %s6016_s9, %s4442_s1  ;;  %p4449_p0 = scmp.lt.u32.totalorder %s4442_s1, %s6016_s9 }
  0x68   : > { %p4445_p4 = pnand %p4443_p12, %p5126_p8 }
  0x6a   : > { %p4446_p13 = pneg %p4445_p4 }
  0x6c   : > { %p4451_p2 = pnand %p4449_p0, %p4446_p13 }
  0x6e   : > { %4454 = shalt.err (!%p4451_p2)
}
  0x6f   : > { %s4455_s0 = scalar_lea.vmem %s5114_s30, 16  ;;  %s4462_s12 = scalar_lea.vmem %s5114_s30, 32 }
  0x70   : > { %p4456_p5 = scmp.ne.s32.totalorder %s5114_s30, %s4455_s0  ;;  %p4463_p10 = scmp.lt.s32.totalorder %s5114_s30, %s5114_s30 }
  0x71   : > { %p4464_p11 = scmp.lt.s32.totalorder %s4462_s12, %s4455_s0 }
  0x72   : > { %p4458_p7 = pnand %p4456_p5, %p5126_p8 }
  0x73   : > { %p4465_p12 = por %p4464_p11, %p4463_p10 }
  0x74   : > { %p4459_p9 = pneg %p4458_p7 }
  0x76   : > { %p4466_p4 = pnand %p4465_p12, %p4459_p9 }
  0x78   : > { %4469 = shalt.err (!%p4466_p4)
}
  0x79   : > { %4210 = dma.hbm_to_vmem [thread:$0]  (!%p5110_p6), %s6016_s9, 16, %s5114_s30, [#allocation15]  }
  0x7a   : > { %s4918_s19 = smov [#allocation20]   ;;  %s6017_s11 = sld [smem:[#allocation52_spill]] }
  0x7b   : > { %s708_s24 = sshll.u32 %s4918_s19, 4  ;;  %s709_s24 = int_to_ptr.vmem [resolvable:$true] %s708_s24 }
  0x80   : > { %s4470_s21 = scalar_lea.hbm %s6017_s11, 16 }
  0x81   : > { %p4471_p13 = scmp.ne.s32.totalorder %s6017_s11, %s4470_s21  ;;  %p4477_p5 = scmp.lt.u32.totalorder %s4470_s21, %s6017_s11 }
  0x83   : > { %p4473_p0 = pnand %p4471_p13, %p5126_p8 }
  0x85   : > { %p4474_p2 = pneg %p4473_p0 }
  0x87   : > { %p4479_p7 = pnand %p4477_p5, %p4474_p2 }
  0x89   : > { %4482 = shalt.err (!%p4479_p7)
}
  0x8a   : > { %s4483_s30 = scalar_lea.vmem %s681_s8, 16  ;;  %s4490_s14 = scalar_lea.vmem %s681_s8, 32 }
  0x8b   : > { %p4484_p9 = scmp.ne.s32.totalorder %s681_s8, %s4483_s30  ;;  %p4491_p12 = scmp.lt.s32.totalorder %s681_s8, %s681_s8 }
  0x8c   : > { %p4492_p4 = scmp.lt.s32.totalorder %s4490_s14, %s4483_s30 }
  0x8d   : > { %p4486_p10 = pnand %p4484_p9, %p5126_p8 }
  0x8e   : > { %p4493_p1 = por %p4492_p4, %p4491_p12 }
  0x8f   : > { %p4487_p11 = pneg %p4486_p10 }
  0x91   : > { %p4494_p3 = pnand %p4493_p1, %p4487_p11 }
  0x93   : > { %4497 = shalt.err (!%p4494_p3)
}
  0x94   : > { %4216 = dma.hbm_to_vmem [thread:$0]  (!%p5110_p6), %s6017_s11, 16, %s681_s8, [#allocation18]  }
  0x95   : > { %s6018_s15 = sld [smem:[#allocation55_spill]] }
  0x9b   : > { %s4498_s21 = scalar_lea.hbm %s6018_s15, 16 }
  0x9c   : > { %p4499_p13 = scmp.ne.s32.totalorder %s6018_s15, %s4498_s21  ;;  %p4505_p3 = scmp.lt.u32.totalorder %s4498_s21, %s6018_s15 }
  0x9e   : > { %p4501_p0 = pnand %p4499_p13, %p5126_p8 }
  0xa0   : > { %p4502_p1 = pneg %p4501_p0 }
  0xa2   : > { %p4507_p2 = pnand %p4505_p3, %p4502_p1 }
  0xa4   : > { %4510 = shalt.err (!%p4507_p2)
}
  0xa5   : > { %s4511_s30 = scalar_lea.vmem %s709_s24, 16  ;;  %s4518_s8 = scalar_lea.vmem %s709_s24, 32 }
  0xa6   : > { %p4512_p5 = scmp.ne.s32.totalorder %s709_s24, %s4511_s30  ;;  %p4519_p10 = scmp.lt.s32.totalorder %s709_s24, %s709_s24 }
  0xa7   : > { %p4520_p11 = scmp.lt.s32.totalorder %s4518_s8, %s4511_s30 }
  0xa8   : > { %p4514_p7 = pnand %p4512_p5, %p5126_p8 }
  0xa9   : > { %p4521_p12 = por %p4520_p11, %p4519_p10 }
  0xaa   : > { %p4515_p9 = pneg %p4514_p7 }
  0xac   : > { %p4522_p4 = pnand %p4521_p12, %p4515_p9 }
  0xae   : > { %4525 = shalt.err (!%p4522_p4)
}
  0xaf   : > { %4222 = dma.hbm_to_vmem [thread:$0]  (!%p5110_p6), %s6018_s15, 16, %s709_s24, [#allocation21]  }
  0xb0   : > { %s4919_s19 = smov [#allocation23]   ;;  %s6019_s17 = sld [smem:[#allocation56_spill]] }
  0xb1   : > { %s730_s1 = sshll.u32 %s4919_s19, 4  ;;  %s731_s1 = int_to_ptr.vmem [resolvable:$true] %s730_s1 }
  0xb6   : > { %s4526_s4 = scalar_lea.hbm %s6019_s17, 16 }
  0xb7   : > { %p4527_p13 = scmp.ne.s32.totalorder %s6019_s17, %s4526_s4  ;;  %p4533_p3 = scmp.lt.u32.totalorder %s4526_s4, %s6019_s17 }
  0xb9   : > { %p4529_p0 = pnand %p4527_p13, %p5126_p8 }
  0xbb   : > { %p4530_p1 = pneg %p4529_p0 }
  0xbd   : > { %p4535_p2 = pnand %p4533_p3, %p4530_p1 }
  0xbf   : > { %4538 = shalt.err (!%p4535_p2)
}
  0xc0   : > { %s4539_s24 = scalar_lea.vmem %s731_s1, 16  ;;  %s4546_s8 = scalar_lea.vmem %s731_s1, 32 }
  0xc1   : > { %p4540_p5 = scmp.ne.s32.totalorder %s731_s1, %s4539_s24  ;;  %p4547_p10 = scmp.lt.s32.totalorder %s731_s1, %s731_s1 }
  0xc2   : > { %p4548_p11 = scmp.lt.s32.totalorder %s4546_s8, %s4539_s24 }
  0xc3   : > { %p4542_p7 = pnand %p4540_p5, %p5126_p8 }
  0xc4   : > { %p4549_p12 = por %p4548_p11, %p4547_p10 }
  0xc5   : > { %p4543_p9 = pneg %p4542_p7 }
  0xc7   : > { %p4550_p4 = pnand %p4549_p12, %p4543_p9 }
  0xc9   : > { %4553 = shalt.err (!%p4550_p4)
}
  0xca   : > { %4228 = dma.hbm_to_vmem [thread:$0]  (!%p5110_p6), %s6019_s17, 16, %s731_s1, [#allocation24]  }
  0xcb   : > { %s3756_s19 = sadd.s32 4294967294, %s4912_s26   ;;  %s5253_s29 = sadd.s32 1, %s4912_s26  }
  0xcc   : > { %6020 = sst [smem:[#allocation38_spill]] %s5253_s29  ;;  %s55_s21 = ssub.s32 %s4912_s26, %s5253_s29 }
  0xcd   : > { %s58_s4 = sadd.s32 1, %s4908_s23  ;;  %p56_p13 = scmp.eq.s32.totalorder %s55_s21, 0 }
  0xce   : > { %p65_p0 = scmp.ne.s32.totalorder %s4908_s23, %s4904_s5  ;;  %p66_p1 = scmp.eq.s32.totalorder %s4912_s26, 0 }
  0xcf   : > { %p71_p3 = scmp.ne.s32.totalorder %s4904_s5, %s4900_s22  ;;  %p6022_p5 = scmp.eq.s32.totalorder %s5092_s6, 0 }
  0xd0   : > { %s5264_s28 = scalar_select %p56_p13, %s4908_s23, %s58_s4  }
  0xd1   : > { %p67_p2 = por %p66_p1, %p65_p0  ;;  %p5268_p7 = por %p6022_p5, %p71_p3 }
  0xd2   : > { %6021 = sst [smem:[#allocation39_spill]] %s5264_s28  ;;  %p593_p9 = scmp.eq.s32.totalorder %s5092_s6, 1 }
  0xd3   : > { %s6023_s1 = scalar_select %p5268_p7, 1, 0 }
  0xd4   : > { %p599_p10 = scmp.eq.s32.totalorder %s3756_s19, 1  ;;  %p4260_p11 = scmp.lt.s32.totalorder %s4912_s26, 2 }
  0xd5   : > { %s5966_s0 = sand.u32 1, %s4908_s23   ;;  %p5275_p12 = por %p593_p9, %p65_p0 }
  0xd6   : > { %p5279_p4 = por %p599_p10, %p71_p3  ;;  %s5285_s24 = sshll.u32 %s5966_s0, 3 }
  0xd7   : > { %s6024_s12 = scalar_select %p5275_p12, 1, 0 }
  0xd8   : > { %s6026_s30 = scalar_select %p5279_p4, 1, 0 }
  0xd9   : > { %6025 = sst [smem:[#allocation40_spill]] %s6024_s12  ;;  %s5288_s8 = sshll.u32 %s4912_s26, 7 }
  0xda   : > { %6027 = sst [smem:[#allocation41_spill]] %s6026_s30  ;;  %p5290_p13 = pnand %p4260_p11, %p67_p2 }
  0xdb   : > { %s5970_s20 = sand.u32 1, %s4912_s26   ;;  %s6029_s4 = sld [smem:[#allocation43_spill]] }
  0xdc   : > { %s6028_s14 = scalar_select %p5290_p13, 1, 0 }
  0xdd   : > { %s791_s0 = scalar_lea.vmem [#allocation5], %s5285_s24  ;;  %s5306_s15 = scalar_lea.sflag [#allocation6], %s5970_s20 }
  0xde   : > { %s798_s11 = sshll.u32 %s791_s0, 4  ;;  %p5312_p1 = pneg %p5290_p13  ;;  %s5302_s11 = int_to_ptr.vmem [resolvable:$true] %s798_s11 }
  0xe0   : > { %s6030_s25 = scalar_select %p5312_p1, 1, 0 }
  0xe1   : > { %s5299_s9 = scalar_lea.hbm %s6029_s4, %s5288_s8  ;;  %s4559_s0 = scalar_lea.hbm %s6029_s4, 256 }
  0xe2   : > { %s4554_s17 = scalar_lea.hbm %s5299_s9, 128  ;;  %p4560_p5 = scmp.lt.u32.totalorder %s5299_s9, %s6029_s4 }
  0xe3   : > { %p4555_p0 = scmp.ne.s32.totalorder %s5299_s9, %s4554_s17  ;;  %p4561_p9 = scmp.lt.u32.totalorder %s4559_s0, %s4554_s17 }
  0xe4   : > { %p4563_p11 = scmp.lt.u32.totalorder %s4554_s17, %s5299_s9 }
  0xe5   : > { %p4557_p3 = pnand %p5312_p1, %p4555_p0  ;;  %p4562_p10 = por %p4561_p9, %p4560_p5 }
  0xe7   : > { %p4558_p2 = pneg %p4557_p3  ;;  %p4564_p4 = por %p4563_p11, %p4562_p10 }
  0xe9   : > { %p4565_p12 = pnand %p4564_p4, %p4558_p2 }
  0xeb   : > { %4568 = shalt.err (!%p4565_p12)
}
  0xec   : > { %s4569_s20 = scalar_lea.vmem %s5302_s11, 128  ;;  %s4920_s19 = smov [#allocation5]  }
  0xed   : > { %p4570_p0 = scmp.ne.s32.totalorder %s5302_s11, %s4569_s20  ;;  %s4574_s21 = sshll.u32 %s4920_s19, 4  ;;  %s4575_s21 = int_to_ptr.vmem [resolvable:$false] %s4574_s21 }
  0xee   : > { %s4576_s27 = scalar_lea.vmem %s4575_s21, 256  ;;  %p4577_p6 = scmp.lt.s32.totalorder %s5302_s11, %s4575_s21 }
  0xef   : > { %p4572_p3 = pnand %p4570_p0, %p5312_p1  ;;  %p4578_p8 = scmp.lt.s32.totalorder %s4576_s27, %s4569_s20 }
  0xf1   : > { %p4573_p7 = pneg %p4572_p3  ;;  %p4579_p5 = por %p4578_p8, %p4577_p6 }
  0xf3   : > { %p4580_p9 = pnand %p4579_p5, %p4573_p7 }
  0xf5   : > { %4583 = shalt.err (!%p4580_p9)
}
  0xf6   : > { %4238 = dma.hbm_to_vmem [thread:$0]  (!%p5290_p13), %s5299_s9, 128, %s5302_s11, %s5306_s15  }
  0xf7   : > { %s4921_s17 = smov [#allocation13]   ;;  %s4922_s0 = smov [#allocation16]  }
  0xf8   : > { %s644_s28 = sshll.u32 %s4921_s17, 4  ;;  %s669_s4 = sshll.u32 %s4922_s0, 4  ;;  %s645_s28 = int_to_ptr.vmem [resolvable:$true] %s644_s28  ;;  %s670_s4 = int_to_ptr.vmem [resolvable:$true] %s669_s4 }
  0xf9   : > { %s6031_s30 = sld [smem:[#allocation49_spill]]  ;;  %p6032_p8 = scmp.ne.s32.totalorder %s6014_s7, 0 }
  0xff   : > { %s4584_s21 = scalar_lea.hbm %s6031_s30, 16 }
 0x100   : > { %p4585_p6 = scmp.ne.s32.totalorder %s6031_s30, %s4584_s21  ;;  %p4591_p4 = scmp.lt.u32.totalorder %s4584_s21, %s6031_s30 }
 0x102   : > { %p4587_p7 = pnand %p4585_p6, %p6032_p8 }
 0x104   : > { %p4588_p12 = pneg %p4587_p7 }
 0x106   : > { %p4593_p2 = pnand %p4591_p4, %p4588_p12 }
 0x108   : > { %4596 = shalt.err (!%p4593_p2)
}
 0x109   : > { %s4597_s9 = scalar_lea.vmem %s645_s28, 16  ;;  %s4604_s11 = scalar_lea.vmem %s645_s28, 32 }
 0x10a   : > { %p4598_p10 = scmp.ne.s32.totalorder %s645_s28, %s4597_s9  ;;  %p4605_p3 = scmp.lt.s32.totalorder %s645_s28, %s645_s28 }
 0x10b   : > { %p4606_p5 = scmp.lt.s32.totalorder %s4604_s11, %s4597_s9 }
 0x10c   : > { %p4600_p11 = pnand %p4598_p10, %p6032_p8 }
 0x10d   : > { %p4607_p9 = por %p4606_p5, %p4605_p3 }
 0x10e   : > { %p4601_p0 = pneg %p4600_p11 }
 0x110   : > { %p4608_p13 = pnand %p4607_p9, %p4601_p0 }
 0x112   : > { %4611 = shalt.err (!%p4608_p13)
}
 0x113   : > { %p6033_p6 = scmp.ne.s32.totalorder %s6012_s3, 0  ;;  %s4612_s0 = scalar_lea.hbm %s5936_s10, 16 }
 0x114   : > { %p4613_p7 = scmp.ne.s32.totalorder %s5936_s10, %s4612_s0  ;;  %p4619_p13 = scmp.lt.u32.totalorder %s4612_s0, %s5936_s10 }
 0x115   : > { %4207 = dma.hbm_to_vmem [thread:$0]  (!%p6033_p6), %s6031_s30, 16, %s645_s28, [#allocation12]  }
 0x116   : > { %p4615_p12 = pnand %p4613_p7, %p6032_p8 }
 0x118   : > { %p4616_p4 = pneg %p4615_p12 }
 0x11a   : > { %p4621_p2 = pnand %p4619_p13, %p4616_p4 }
 0x11c   : > { %4624 = shalt.err (!%p4621_p2)
}
 0x11d   : > { %s4625_s9 = scalar_lea.vmem %s670_s4, 16  ;;  %s4632_s28 = scalar_lea.vmem %s670_s4, 32 }
 0x11e   : > { %p4626_p10 = scmp.ne.s32.totalorder %s670_s4, %s4625_s9  ;;  %p4633_p3 = scmp.lt.s32.totalorder %s670_s4, %s670_s4 }
 0x11f   : > { %p4634_p5 = scmp.lt.s32.totalorder %s4632_s28, %s4625_s9 }
 0x120   : > { %p4628_p11 = pnand %p4626_p10, %p6032_p8 }
 0x121   : > { %p4635_p9 = por %p4634_p5, %p4633_p3 }
 0x122   : > { %p4629_p0 = pneg %p4628_p11 }
 0x124   : > { %p4636_p1 = pnand %p4635_p9, %p4629_p0 }
 0x126   : > { %4639 = shalt.err (!%p4636_p1)
}
 0x127   : > { %4213 = dma.hbm_to_vmem [thread:$0]  (!%p6033_p6), %s5936_s10, 16, %s670_s4, [#allocation15]  }
 0x128   : > { %s4923_s17 = smov [#allocation19]   ;;  %s4924_s12 = smov [#allocation22]  }
 0x129   : > { %s694_s22 = sshll.u32 %s4923_s17, 4  ;;  %s719_s0 = sshll.u32 %s4924_s12, 4  ;;  %s695_s22 = int_to_ptr.vmem [resolvable:$true] %s694_s22  ;;  %s720_s0 = int_to_ptr.vmem [resolvable:$true] %s719_s0 }
 0x12a   : > { %s4640_s20 = scalar_lea.hbm %s5939_s13, 16 }
 0x12b   : > { %p4641_p1 = scmp.ne.s32.totalorder %s5939_s13, %s4640_s20  ;;  %p4647_p4 = scmp.lt.u32.totalorder %s4640_s20, %s5939_s13 }
 0x12d   : > { %p4643_p7 = pnand %p4641_p1, %p6032_p8 }
 0x12f   : > { %p4644_p12 = pneg %p4643_p7 }
 0x131   : > { %p4649_p13 = pnand %p4647_p4, %p4644_p12 }
 0x133   : > { %4652 = shalt.err (!%p4649_p13)
}
 0x134   : > { %s4653_s4 = scalar_lea.vmem %s695_s22, 16  ;;  %s4660_s29 = scalar_lea.vmem %s695_s22, 32 }
 0x135   : > { %p4654_p2 = scmp.ne.s32.totalorder %s695_s22, %s4653_s4  ;;  %p4661_p0 = scmp.lt.s32.totalorder %s695_s22, %s695_s22 }
 0x136   : > { %p4662_p3 = scmp.lt.s32.totalorder %s4660_s29, %s4653_s4 }
 0x137   : > { %p4656_p10 = pnand %p4654_p2, %p6032_p8 }
 0x138   : > { %p4663_p5 = por %p4662_p3, %p4661_p0 }
 0x139   : > { %p4657_p11 = pneg %p4656_p10 }
 0x13b   : > { %p4664_p9 = pnand %p4663_p5, %p4657_p11 }
 0x13d   : > { %4667 = shalt.err (!%p4664_p9)
}
 0x13e   : > { %4219 = dma.hbm_to_vmem [thread:$0]  (!%p6033_p6), %s5939_s13, 16, %s695_s22, [#allocation18]  }
 0x13f   : > { %s4668_s20 = scalar_lea.hbm %s5942_s16, 16 }
 0x140   : > { %p4669_p1 = scmp.ne.s32.totalorder %s5942_s16, %s4668_s20  ;;  %p4675_p4 = scmp.lt.u32.totalorder %s4668_s20, %s5942_s16 }
 0x142   : > { %p4671_p7 = pnand %p4669_p1, %p6032_p8 }
 0x144   : > { %p4672_p12 = pneg %p4671_p7 }
 0x146   : > { %p4677_p13 = pnand %p4675_p4, %p4672_p12 }
 0x148   : > { %4680 = shalt.err (!%p4677_p13)
}
 0x149   : > { %s4681_s4 = scalar_lea.vmem %s720_s0, 16  ;;  %s4688_s22 = scalar_lea.vmem %s720_s0, 32 }
 0x14a   : > { %p4682_p2 = scmp.ne.s32.totalorder %s720_s0, %s4681_s4  ;;  %p4689_p0 = scmp.lt.s32.totalorder %s720_s0, %s720_s0 }
 0x14b   : > { %p4690_p3 = scmp.lt.s32.totalorder %s4688_s22, %s4681_s4 }
 0x14c   : > { %p4684_p10 = pnand %p4682_p2, %p6032_p8 }
 0x14d   : > { %p4691_p5 = por %p4690_p3, %p4689_p0 }
 0x14e   : > { %p4685_p11 = pneg %p4684_p10 }
 0x150   : > { %p4692_p9 = pnand %p4691_p5, %p4685_p11 }
 0x152   : > { %4695 = shalt.err (!%p4692_p9)
}
 0x153   : > { %4225 = dma.hbm_to_vmem [thread:$0]  (!%p6033_p6), %s5942_s16, 16, %s720_s0, [#allocation21]  }
 0x154   : > { %s4925_s12 = smov [#allocation25]   ;;  %s4696_s27 = scalar_lea.hbm %s5944_s18, 512 }
 0x155   : > { %s740_s19 = sshll.u32 %s4925_s12, 4  ;;  %p4697_p1 = scmp.ne.s32.totalorder %s5944_s18, %s4696_s27  ;;  %s741_s19 = int_to_ptr.vmem [resolvable:$true] %s740_s19 }
 0x156   : > { %p4703_p4 = scmp.lt.u32.totalorder %s4696_s27, %s5944_s18 }
 0x157   : > { %p4699_p7 = pnand %p4697_p1, %p6032_p8 }
 0x159   : > { %p4700_p12 = pneg %p4699_p7 }
 0x15b   : > { %p4705_p13 = pnand %p4703_p4, %p4700_p12 }
 0x15d   : > { %4708 = shalt.err (!%p4705_p13)
}
 0x15e   : > { %s4709_s0 = scalar_lea.vmem %s741_s19, 512  ;;  %p4717_p0 = scmp.lt.s32.totalorder %s741_s19, %s741_s19 }
 0x15f   : > { %p4710_p2 = scmp.ne.s32.totalorder %s741_s19, %s4709_s0  ;;  %p4718_p3 = scmp.lt.s32.totalorder %s4709_s0, %s4709_s0 }
 0x161   : > { %p4712_p10 = pnand %p4710_p2, %p6032_p8  ;;  %p4719_p5 = por %p4718_p3, %p4717_p0 }
 0x163   : > { %p4713_p11 = pneg %p4712_p10 }
 0x165   : > { %p4720_p9 = pnand %p4719_p5, %p4713_p11 }
 0x167   : > { %4723 = shalt.err (!%p4720_p9)
}
 0x168   : > { %s4926_s22 = smov 128   ;;  %s4927_s29 = smov 8  }
 0x169   : > { %4231 = dma.hbm_to_vmem [thread:$0]  (!%p6033_p6), %s5944_s18, 512, %s741_s19, [#allocation24], %s4926_s22, %s4926_s22, %s4927_s29  }
 0x16a   : > { %s6034_s20 = sld [smem:[#allocation42_spill]]  ;;  %s773_s9 = scalar_lea.vmem [#allocation2], %s5285_s24 }
 0x16b   : > { %s780_s28 = sshll.u32 %s773_s9, 4  ;;  %s6035_s11 = sand.u32 1, %s4908_s23   ;;  %s781_s28 = int_to_ptr.vmem [resolvable:$true] %s780_s28 }
 0x16c   : > { %s770_s4 = scalar_lea.sflag [#allocation3], %s6035_s11  ;;  %p6036_p1 = scmp.ne.s32.totalorder %s6030_s25, 0 }
 0x170   : > { %s5430_s27 = scalar_lea.hbm %s6034_s20, %s5288_s8  ;;  %s4729_s22 = scalar_lea.hbm %s6034_s20, 256 }
 0x171   : > { %s4724_s0 = scalar_lea.hbm %s5430_s27, 128  ;;  %p4730_p6 = scmp.lt.u32.totalorder %s5430_s27, %s6034_s20 }
 0x172   : > { %p4725_p8 = scmp.ne.s32.totalorder %s5430_s27, %s4724_s0  ;;  %p4731_p4 = scmp.lt.u32.totalorder %s4729_s22, %s4724_s0 }
 0x173   : > { %p4733_p2 = scmp.lt.u32.totalorder %s4724_s0, %s5430_s27 }
 0x174   : > { %p4727_p7 = pnand %p4725_p8, %p6036_p1  ;;  %p4732_p13 = por %p4731_p4, %p4730_p6 }
 0x176   : > { %p4728_p12 = pneg %p4727_p7  ;;  %p4734_p10 = por %p4733_p2, %p4732_p13 }
 0x178   : > { %p4735_p11 = pnand %p4734_p10, %p4728_p12 }
 0x17a   : > { %4738 = shalt.err (!%p4735_p11)
}
 0x17b   : > { %s4739_s12 = scalar_lea.vmem %s781_s28, 128  ;;  %s4928_s7 = smov [#allocation2]  }
 0x17c   : > { %p4740_p0 = scmp.ne.s32.totalorder %s781_s28, %s4739_s12  ;;  %s4744_s21 = sshll.u32 %s4928_s7, 4  ;;  %s4745_s21 = int_to_ptr.vmem [resolvable:$false] %s4744_s21 }
 0x17d   : > { %s4746_s9 = scalar_lea.vmem %s4745_s21, 256  ;;  %p4747_p9 = scmp.lt.s32.totalorder %s781_s28, %s4745_s21 }
 0x17e   : > { %p4742_p3 = pnand %p4740_p0, %p6036_p1  ;;  %p4748_p8 = scmp.lt.s32.totalorder %s4746_s9, %s4739_s12 }
 0x180   : > { %p4743_p5 = pneg %p4742_p3  ;;  %p4749_p7 = por %p4748_p8, %p4747_p9 }
 0x182   : > { %p4750_p4 = pnand %p4749_p7, %p4743_p5 }
 0x184   : > { %4753 = shalt.err (!%p4750_p4)
}
 0x185   : > { %p6037_p6 = scmp.ne.s32.totalorder %s6028_s14, 0  ;;  %s6038_s3 = sld [smem:[#allocation44_spill]] }
 0x186   : > { %s809_s22 = scalar_lea.vmem [#allocation7], %s5285_s24 }
 0x187   : > { %4235 = dma.hbm_to_vmem [thread:$0]  (!%p6037_p6), %s5430_s27, 128, %s781_s28, %s770_s4  }
 0x188   : > { %s816_s29 = sshll.u32 %s809_s22, 4  ;;  %s817_s29 = int_to_ptr.vmem [resolvable:$true] %s816_s29 }
 0x18b   : > { %s5456_s19 = scalar_lea.hbm %s6038_s3, %s5288_s8  ;;  %s4759_s27 = scalar_lea.hbm %s6038_s3, 256 }
 0x18c   : > { %s4754_s17 = scalar_lea.hbm %s5456_s19, 128  ;;  %p4760_p10 = scmp.lt.u32.totalorder %s5456_s19, %s6038_s3 }
 0x18d   : > { %p4755_p12 = scmp.ne.s32.totalorder %s5456_s19, %s4754_s17  ;;  %p4761_p11 = scmp.lt.u32.totalorder %s4759_s27, %s4754_s17 }
 0x18e   : > { %p4763_p3 = scmp.lt.u32.totalorder %s4754_s17, %s5456_s19 }
 0x18f   : > { %p4757_p13 = pnand %p4755_p12, %p6036_p1  ;;  %p4762_p0 = por %p4761_p11, %p4760_p10 }
 0x191   : > { %p4758_p2 = pneg %p4757_p13  ;;  %p4764_p5 = por %p4763_p3, %p4762_p0 }
 0x193   : > { %p4765_p9 = pnand %p4764_p5, %p4758_p2 }
 0x195   : > { %4768 = shalt.err (!%p4765_p9)
}
 0x196   : > { %s4769_s21 = scalar_lea.vmem %s817_s29, 128  ;;  %s4929_s9 = smov [#allocation7]  }
 0x197   : > { %p4770_p8 = scmp.ne.s32.totalorder %s817_s29, %s4769_s21  ;;  %s4774_s11 = sshll.u32 %s4929_s9, 4  ;;  %s4775_s11 = int_to_ptr.vmem [resolvable:$false] %s4774_s11 }
 0x198   : > { %s4776_s0 = scalar_lea.vmem %s4775_s11, 256  ;;  %p4777_p12 = scmp.lt.s32.totalorder %s817_s29, %s4775_s11 }
 0x199   : > { %p4772_p7 = pnand %p4770_p8, %p6036_p1  ;;  %p4778_p13 = scmp.lt.s32.totalorder %s4776_s0, %s4769_s21 }
 0x19b   : > { %p4773_p4 = pneg %p4772_p7  ;;  %p4779_p6 = por %p4778_p13, %p4777_p12 }
 0x19d   : > { %p4780_p10 = pnand %p4779_p6, %p4773_p4 }
 0x19f   : > { %4783 = shalt.err (!%p4780_p10)
}
 0x1a0   : > { %p6039_p11 = scmp.ne.s32.totalorder %s6028_s14, 0  ;;  %s6040_s12 = sld [smem:[#allocation45_spill]] }
 0x1a1   : > { %s827_s27 = scalar_lea.vmem [#allocation8], %s5285_s24  ;;  %s6041_s4 = sand.u32 1, %s4912_s26  }
 0x1a2   : > { %4241 = dma.hbm_to_vmem [thread:$0]  (!%p6039_p11), %s5456_s19, 128, %s817_s29, %s5306_s15  }
 0x1a3   : > { %s834_s28 = sshll.u32 %s827_s27, 4  ;;  %s824_s21 = scalar_lea.sflag [#allocation9], %s6041_s4  ;;  %s835_s28 = int_to_ptr.vmem [resolvable:$true] %s834_s28 }
 0x1a6   : > { %s5481_s7 = scalar_lea.hbm %s6040_s12, %s5288_s8  ;;  %s4789_s29 = scalar_lea.hbm %s6040_s12, 256 }
 0x1a7   : > { %s4784_s9 = scalar_lea.hbm %s5481_s7, 128  ;;  %p4790_p3 = scmp.lt.u32.totalorder %s5481_s7, %s6040_s12 }
 0x1a8   : > { %p4785_p6 = scmp.ne.s32.totalorder %s5481_s7, %s4784_s9  ;;  %p4791_p5 = scmp.lt.u32.totalorder %s4789_s29, %s4784_s9 }
 0x1a9   : > { %p4793_p8 = scmp.lt.u32.totalorder %s4784_s9, %s5481_s7 }
 0x1aa   : > { %p4787_p2 = pnand %p4785_p6, %p6036_p1  ;;  %p4792_p9 = por %p4791_p5, %p4790_p3 }
 0x1ac   : > { %p4788_p0 = pneg %p4787_p2  ;;  %p4794_p7 = por %p4793_p8, %p4792_p9 }
 0x1ae   : > { %p4795_p4 = pnand %p4794_p7, %p4788_p0 }
 0x1b0   : > { %4798 = shalt.err (!%p4795_p4)
}
 0x1b1   : > { %s4799_s24 = scalar_lea.vmem %s835_s28, 128  ;;  %s4930_s0 = smov [#allocation8]  }
 0x1b2   : > { %p4800_p12 = scmp.ne.s32.totalorder %s835_s28, %s4799_s24  ;;  %s4804_s22 = sshll.u32 %s4930_s0, 4  ;;  %s4805_s22 = int_to_ptr.vmem [resolvable:$false] %s4804_s22 }
 0x1b3   : > { %s4806_s17 = scalar_lea.vmem %s4805_s22, 256  ;;  %p4807_p6 = scmp.lt.s32.totalorder %s835_s28, %s4805_s22 }
 0x1b4   : > { %p4802_p13 = pnand %p4800_p12, %p6036_p1  ;;  %p4808_p2 = scmp.lt.s32.totalorder %s4806_s17, %s4799_s24 }
 0x1b6   : > { %p4803_p10 = pneg %p4802_p13  ;;  %p4809_p11 = por %p4808_p2, %p4807_p6 }
 0x1b8   : > { %p4810_p3 = pnand %p4809_p11, %p4803_p10 }
 0x1ba   : > { %4813 = shalt.err (!%p4810_p3)
}
 0x1bb   : > { %p6042_p5 = scmp.ne.s32.totalorder %s6028_s14, 0  ;;  %p6043_p0 = scmp.ne.s32.totalorder %s6011_s2, 0 }
 0x1bc   : > { %s5506_s25 = sand.u32 (!%p6043_p0), 1, %s4904_s5   ;;  %p6044_p1 = scmp.ne.s32.totalorder (!%p6043_p0), %s6023_s1, 0 }
 0x1bd   : > { %4244 = dma.hbm_to_vmem [thread:$0]  (!%p6042_p5), %s5481_s7, 128, %s835_s28, %s824_s21  }
 0x1be   : > { %843 = sbr.rel (%p6043_p0) target bundleno = 7045 (0x1b85), region = 116  ;;  %s5509_s27 = sshll.u32 (!%p6043_p0), %s5506_s25, 3 }
 0x1bf   : > { %s846_s4 = scalar_lea.sflag (!%p6043_p0), [#allocation3], %s5506_s25  ;;  %s849_s9 = scalar_lea.vmem (!%p6043_p0), [#allocation2], %s5509_s27 }
 0x1c5   : > { %4859 = dma.done.wait (%p6044_p1), %s846_s4, 128  }
 0x1c6   : > { %4861 = vsyncadd (%p6044_p1), %s846_s4, 4294967168  ;;  %s854_s2 = sand.u32 1, %s5092_s6   ;;  %s858_s7 = scalar_lea.vmem [#allocation5], %s5509_s27 }
 0x1c7   : > { %s855_s14 = scalar_lea.sflag [#allocation6], %s854_s2 }
 0x1c8   : > { %4863 = dma.done.wait (%p6044_p1), %s855_s14, 256  }
 0x1c9   : > { %4865 = vsyncadd (%p6044_p1), %s855_s14, 4294967040  ;;  %s867_s28 = scalar_lea.vmem [#allocation7], %s5509_s27  ;;  %s873_s21 = scalar_lea.sflag [#allocation9], %s854_s2 }
 0x1ca   : > { %s876_s15 = scalar_lea.vmem [#allocation8], %s5509_s27 }
 0x1cb   : > { %4867 = dma.done.wait (%p6044_p1), %s873_s21, 128  }
 0x1cc   : > { %4869 = vsyncadd (%p6044_p1), %s873_s21, 4294967168  ;;  %p6045_p11 = scmp.eq.s32.totalorder %s5092_s6, 0 }
 0x1ce   : > { %4871 = dma.done.wait (%p6045_p11), [#allocation9], 16   ;;  %p6046_p9 = pmov %p6045_p11 }
 0x1d0   : > { %4873 = vsyncadd (%p6046_p9), [#allocation9], 4294967280  ;;  %p6047_p8 = pmov %p6046_p9 }
 0x1d2   : > { %4875 = dma.done.wait (%p6047_p8), [#allocation12], 32   ;;  %p6048_p7 = pmov %p6047_p8 }
 0x1d4   : > { %4877 = vsyncadd (%p6048_p7), [#allocation12], 4294967264  ;;  %p6049_p4 = pmov %p6048_p7 }
 0x1d6   : > { %4879 = dma.done.wait (%p6049_p4), [#allocation15], 32   ;;  %p6050_p12 = pmov %p6049_p4 }
 0x1d7   : > { %p6051_p13 = pmov %p6049_p4 }
 0x1d8   : > { %4881 = vsyncadd (%p6050_p12), [#allocation15], 4294967264 }
 0x1d9   : > { %4883 = dma.done.wait (%p6051_p13), [#allocation18], 32   ;;  %p6052_p10 = pmov %p6049_p4 }
 0x1da   : > { %p6053_p6 = pmov %p6049_p4 }
 0x1db   : > { %4885 = vsyncadd (%p6052_p10), [#allocation18], 4294967264 }
 0x1dc   : > { %4887 = dma.done.wait (%p6053_p6), [#allocation21], 32   ;;  %p6054_p2 = pmov %p6049_p4 }
 0x1de   : > { %4889 = vsyncadd (%p6054_p2), [#allocation21], 4294967264  ;;  %p6055_p3 = pmov %p6054_p2 }
 0x1df   : > { %p6056_p5 = pmov %p6054_p2 }
 0x1e0   : > { %4891 = dma.done.wait (%p6055_p3), [#allocation24], 528  }
 0x1e1   : > { %4893 = vsyncadd (%p6056_p5), [#allocation24], 4294966768  ;;  %vm1004_vm0 = vcmask 261120   ;;  %v5553_v0 = vld [vmem:[%s849_s9] sm:$0xff]  ;;  %s6057_s29 = sld [smem:[#allocation48_spill]]  ;;  %v4931_v10 = vmov 0.0|0.0  }
 0x1e2   : > { %v1005_v1 = vsel %vm1004_vm0, %v5553_v0, 0.0  ;;  %4108 = vmatprep.subr.bf16.mxu0 %v4931_v10  ;;  %vm4932_vm1 = vmmov 0   ;;  %v4933_v13 = vmov 0.0   ;;  %v3795_v23 = vld [vmem:[#allocation10] ss:$0 sm:$0xff]  ;;  %s4934_s4 = smov 120  }
 0x1e3   : > { %1006 = vadd.xlane.f32.xlu0 %v1005_v1  ;;  %3933 = vmatprep.mubr.msk.f32.mxu0 %vm4932_vm1, %v4933_v13  ;;  %v3796_v26 = vld [vmem:[#allocation11] ss:$0 sm:$0xff]  ;;  %v3797_v29 = vld [vmem:[#allocation13] ss:$0 sm:$0xff]  ;;  %s4935_s9 = smov 96   ;;  %s4936_s2 = smov 88  }
 0x1e4   : > { %3941 = vmatprep.subr.mxu1 %v4933_v13  ;;  %3943 = vmatprep.mubr.msk.f32.mxu1 %vm4932_vm1, %v4933_v13  ;;  %vm1134_vm4 = vcmask 64512   ;;  %v5603_v36 = vld [vmem:[%s876_s15] sm:$0xff]  ;;  %s4937_s14 = smov 56   ;;  %s4938_s21 = smov 64   ;;  %vm3418_vm11 = vcmask 523264  }
 0x1e5   : > { %vm1210_vm5 = vcmp.eq.f32.partialorder %v5603_v36, 0.0  ;;  %s5988_s15 = smov 80   ;;  %s4940_s1 = smov 112  }
 0x1e6   : > { %s6058_s11 = sld [smem:[#allocation50_spill]]  ;;  %s4941_s22 = smov 48  }
 0x1e7   : > { %v1043_v7 = vld [vmem:[%s6057_s29] sm:$0xff]  ;;  %v1044_v8 = vld [vmem:[%s6057_s29 + $0x8] sm:$0xff]  ;;  %v1045_v9 = vld [vmem:[%s6057_s29 + $0x10] sm:$0xff]  ;;  %s5989_s17 = smov 104   ;;  %s4944_s8 = smov 40  }
 0x1e8   : > { %v4109_v11 = vpack.c.bf16 %v1044_v8, %v1043_v7  ;;  %v1046_v12 = vld [vmem:[%s6057_s29 + $0x18] sm:$0xff]  ;;  %s6059_s19 = sld [smem:[#allocation53_spill]]  ;;  %s999_s24 = scalar_lea.vmem [#allocation26], %s5509_s27 }
 0x1e9   : > { %v4112_v14 = vpack.c.bf16 %v1046_v12, %v1045_v9  ;;  %s3516_s0 = sshll.u32 %s999_s24, 4  ;;  %s4945_s27 = smov [#allocation26]   ;;  %s5883_s0 = int_to_ptr.vmem [resolvable:$true] %s3516_s0 }
 0x1ea   : > { %4110 = vmatpush3.bf16.msra.mxu0 %v4109_v11 }
 0x1eb   : > { %4111 = vmatprep.subr.bf16.mxu0 %v4931_v10 }
 0x1ec   : > { %v1128_v57 = vld [vmem:[%s6058_s11 + $0x8] sm:$0xff] }
 0x1ee   : > { %4113 = vmatpush3.bf16.msra.mxu0 %v4112_v14 }
 0x1ef   : > { %3936 = vmatprep.subr.mxu0 %v4933_v13 }
 0x270   : > { %v1007_v2 = vpop.xlane.xlu0 %1006 }
 0x271   : > { %v1009_v3 = vmul.f32 0.03125, %v1007_v2 }
 0x273   : > { %v1010_v4 = vsub.f32 %v5553_v0, %v1009_v3  ;;  %v1127_v3 = vld [vmem:[%s6058_s11] sm:$0xff] }
 0x275   : > { %v1011_v5 = vmul.f32 %v1010_v4, %v1010_v4  ;;  %v1031_v24 = vmul.f32 %v3795_v23, %v1010_v4 }
 0x277   : > { %v1012_v6 = vsel %vm1004_vm0, %v1011_v5, 0.0 }
 0x278   : > { %1013 = vadd.xlane.f32.xlu0 %v1012_v6 }
 0x305   : > { %v1014_v15 = vpop.xlane.xlu0 %1013 }
 0x306   : > { %v1016_v16 = vmul.f32 0.032258064, %v1014_v15 }
 0x308   : > { %4342 = vrsqrt.f32 %v1016_v16  ;;  %vm1019_vm2 = vcmp.eq.f32.partialorder %v1016_v16, inf  ;;  %v1022_v19 = vand.u32 2147483648, %v1016_v16  ;;  %vm1021_vm3 = vcmp.eq.f32.partialorder %v1016_v16, 0.0 }
 0x312   : > { %v4343_v17 = vpop.eup %4342 }
 0x313   : > { %v1018_v18 = vmul.f32 %v4343_v17, %v1016_v16 }
 0x315   : > { %v1020_v20 = vsel %vm1019_vm2, %v1016_v16, %v1018_v18 }
 0x316   : > { %v1023_v21 = vsel %vm1021_vm3, %v1022_v19, %v1020_v20 }
 0x317   : > { %v1032_v22 = vadd.f32 1e-06, %v1023_v21 }
 0x319   : > { %4344 = vrcp.f32 %v1032_v22 }
 0x323   : > { %v4345_v25 = vpop.eup %4344 }
 0x324   : > { %v1034_v27 = vmul.f32 %v4345_v25, %v1031_v24 }
 0x326   : > { %v1042_v28 = vadd.f32 %v3796_v26, %v1034_v27 }
 0x328   : > { %3934 = vmatmul.mubr.msk.f32.vlgmr.msra.gmra.mrb[0].mxu0 %vm1004_vm0, %v1042_v28 }
 0x329   : > { %3938 = vmatprep.mubr.msk.f32.mxu0 %vm4932_vm1, %v4933_v13 }
 0x3fb   : > { %v1123_v30 = vpop.f32.mrb[0].mxu0 }
 0x3fc   : > { %v5582_v31 = vadd.f32 %v3797_v29, %v1123_v30  ;;  %v3935_v32 = vpop.f32.mrb[1].mxu0 }
 0x3fe   : > { %1299 = vrot.lane.b32.xlu0 %v5582_v31, %s4934_s4  ;;  %1132 = vrot.lane.b32.xlu1 %v5582_v31, %s4935_s9 }
 0x402   : > { %1301 = vrot.lane.b32.xlu1 %v5582_v31, %s4936_s2 }
 0x470   : > { %v1133_v33 = vpop.permute.xlu1 %1132  ;;  %v1300_v35 = vpop.permute.xlu0 %1299 }
 0x471   : > { %3937 = vmatpush3.xpose.msk.msra.mxu0 %vm1134_vm4, %v1133_v33 }
 0x472   : > { %3946 = vmatprep.subr.mxu0 %v4933_v13 }
 0x474   : > { %3939 = vmatmul.mubr.msk.f32.vlgmr.msra.gmra.mrb[2].mxu0 %vm1134_vm4, %v5582_v31  ;;  %v1302_v34 = vpop.permute.xlu1 %1301 }
 0x475   : > { %3947 = vmatpush3.xpose.msk.msra.mxu0 %vm1134_vm4, %v1302_v34  ;;  %3948 = vmatprep.mubr.msk.f32.mxu0 %vm4932_vm1, %v4933_v13  ;;  %v1129_v34 = vld [vmem:[%s6058_s11 + $0x10] sm:$0xff] }
 0x476   : > { %3956 = vmatprep.subr.mxu0 %v4933_v13 }
 0x478   : > { %3949 = vmatmul.mubr.msk.f32.vlgmr.msra.gmra.mrb[4].mxu0 %vm1134_vm4, %v1300_v35 }
 0x479   : > { %3958 = vmatprep.mubr.msk.f32.mxu0 %vm4932_vm1, %v4933_v13  ;;  %3957 = vmatpush3.msra.mxu0 %v1128_v57  ;;  %v3815_v57 = vld [vmem:[#allocation14] ss:$0 sm:$0xff] }
 0x47a   : > { %3966 = vmatprep.subr.mxu0 %v4933_v13 }
 0x547   : > { %v1205_v37 = vpop.f32.mrb[2].mxu0 }
 0x548   : > { %v1209_v38 = vmul.f32 0.35355338, %v1205_v37  ;;  %v3940_v39 = vpop.f32.mrb[3].mxu0 }
 0x54a   : > { %v1211_v40 = vsel %vm1210_vm5, -1e+09, %v1209_v38 }
 0x54b   : > { %v1373_v41 = vpop.f32.mrb[4].mxu0  ;;  %v1212_v42 = vsel %vm1134_vm4, %v1211_v40, -inf }
 0x54c   : > { %v1377_v43 = vmul.f32 0.35355338, %v1373_v41  ;;  %1213 = vmax.xlane.f32.xlu1 %v1212_v42  ;;  %v3950_v44 = vpop.f32.mrb[5].mxu0 }
 0x54e   : > { %v1378_v45 = vsel %vm1210_vm5, -1e+09, %v1377_v43 }
 0x54f   : > { %v1379_v46 = vsel %vm1134_vm4, %v1378_v45, -inf }
 0x550   : > { %1380 = vmax.xlane.f32.xlu0 %v1379_v46 }
 0x566   : > { %1390 = vrot.lane.b32.xlu0 %v5582_v31, %s4937_s14  ;;  %s5987_s14 = smov 72  }
 0x5d9   : > { %v1214_v47 = vpop.xlane.xlu1 %1213 }
 0x5da   : > { %v1215_v48 = vsub.f32 %v1211_v40, %v1214_v47 }
 0x5dc   : > { %v1216_v49 = vmul.f32 1.442695, %v1215_v48  ;;  %v1130_v48 = vld [vmem:[%s6058_s11 + $0x18] sm:$0xff] }
 0x5dd   : > { %v1381_v50 = vpop.xlane.xlu0 %1380 }
 0x5de   : > { %4346 = vpow2.f32 %v1216_v49  ;;  %v1382_v51 = vsub.f32 %v1378_v45, %v1381_v50 }
 0x5e0   : > { %v1383_v52 = vmul.f32 1.442695, %v1382_v51 }
 0x5e1   : > { %v1391_v63 = vpop.permute.xlu0 %1390 }
 0x5e2   : > { %4348 = vpow2.f32 %v1383_v52 }
 0x5e8   : > { %v4347_v53 = vpop.eup %4346 }
 0x5e9   : > { %v1218_v54 = vsel %vm1134_vm4, %v4347_v53, 0.0 }
 0x5ea   : > { %1219 = vadd.xlane.f32.xlu1 %v1218_v54 }
 0x5ec   : > { %v4349_v55 = vpop.eup %4348 }
 0x5ed   : > { %v1385_v56 = vsel %vm1134_vm4, %v4349_v55, 0.0 }
 0x5ee   : > { %1386 = vadd.xlane.f32.xlu1 %v1385_v56 }
 0x5ff   : > { %1223 = vrot.lane.b32.xlu1 %v5582_v31, %s4938_s21  ;;  %s6067_s21 = sld [smem:[#allocation59_spill]] }
 0x603   : > { %1614 = vrot.lane.b32.xlu1 %v5582_v31, %s5988_s15  ;;  %s6061_s15 = smov 104  }
 0x607   : > { %1612 = vrot.lane.b32.xlu1 %v5582_v31, %s4940_s1 }
 0x677   : > { %v1220_v58 = vpop.xlane.xlu1 %1219 }
 0x678   : > { %4350 = vrcp.f32 %v1220_v58 }
 0x67b   : > { %v1387_v59 = vpop.xlane.xlu1 %1386 }
 0x67c   : > { %4352 = vrcp.f32 %v1387_v59 }
 0x67f   : > { %v1224_v60 = vpop.permute.xlu1 %1223 }
 0x680   : > { %3942 = vmatpush3.msra.mxu1 %v1224_v60 }
 0x681   : > { %3951 = vmatprep.subr.mxu1 %v4933_v13 }
 0x682   : > { %v4351_v61 = vpop.eup %4350 }
 0x683   : > { %v1222_v62 = vmul.f32 %v4351_v61, %v4347_v53  ;;  %v1615_v6 = vpop.permute.xlu1 %1614 }
 0x685   : > { %3944 = vmatmul.mubr.msk.f32.vlgmr.msra.gmra.mrb[0].mxu1 %vm1134_vm4, %v1222_v62 }
 0x686   : > { %v4353_v1 = vpop.eup %4352  ;;  %3952 = vmatpush3.msra.mxu1 %v1391_v63  ;;  %3953 = vmatprep.mubr.msk.f32.mxu1 %vm4932_vm1, %v4933_v13  ;;  %v2139_v63 = vld [vmem:[%s6059_s19] sm:$0xff] }
 0x687   : > { %v1389_v2 = vmul.f32 %v4353_v1, %v4349_v55  ;;  %3961 = vmatprep.subr.mxu1 %v4933_v13  ;;  %v1613_v9 = vpop.permute.xlu1 %1612  ;;  %v2140_v1 = vld [vmem:[%s6059_s19 + $0x8] sm:$0xff] }
 0x689   : > { %3954 = vmatmul.mubr.msk.f32.vlgmr.msra.gmra.mrb[2].mxu1 %vm1134_vm4, %v1389_v2  ;;  %v4332_v2 = vpack.i.bf16 %v2140_v1, %v2139_v63 }
 0x68a   : > { %3963 = vmatprep.mubr.msk.f32.mxu1 %vm4932_vm1, %v4933_v13  ;;  %3962 = vmatpush3.msra.mxu1 %v1127_v3  ;;  %v4115_v3 = vpack.c.bf16 %v2140_v1, %v2139_v63 }
 0x68b   : > { %3971 = vmatprep.subr.mxu1 %v4933_v13 }
 0x758   : > { %v1295_v4 = vpop.f32.mrb[0].mxu1 }
 0x759   : > { %v3945_v5 = vpop.f32.mrb[1].mxu1  ;;  %3964 = vmatmul.mubr.msk.f32.vlgmr.msra.gmra.mrb[4].mxu1 %vm1134_vm4, %v1295_v4  ;;  %v2142_v4 = vld [vmem:[%s6059_s19 + $0x18] sm:$0xff] }
 0x75a   : > { %3973 = vmatprep.mubr.msk.f32.mxu1 %vm4932_vm1, %v4933_v13 }
 0x75c   : > { %v1462_v7 = vpop.f32.mrb[2].mxu1 }
 0x75d   : > { %v3955_v8 = vpop.f32.mrb[3].mxu1  ;;  %3959 = vmatmul.mubr.msk.f32.vlgmr.msra.gmra.mrb[6].mxu0 %vm1134_vm4, %v1462_v7 }
 0x75e   : > { %3967 = vmatpush3.xpose.msk.msra.mxu0 %vm1134_vm4, %v1615_v6  ;;  %3968 = vmatprep.mubr.msk.f32.mxu0 %vm4932_vm1, %v4933_v13 }
 0x75f   : > { %3976 = vmatprep.subr.mxu0 %v4933_v13 }
 0x761   : > { %3969 = vmatmul.mubr.msk.f32.vlgmr.msra.gmra.mrb[8].mxu0 %vm1134_vm4, %v1613_v9 }
 0x762   : > { %3978 = vmatprep.mubr.msk.f32.mxu0 %vm4932_vm1, %v4933_v13  ;;  %3977 = vmatpush3.msra.mxu0 %v1129_v34 }
 0x763   : > { %3986 = vmatprep.subr.mxu0 %v4933_v13 }
 0x82c   : > { %v1608_v11 = vpop.f32.mrb[4].mxu1 }
 0x82d   : > { %v3965_v12 = vpop.f32.mrb[5].mxu1 }
 0x830   : > { %v1535_v14 = vpop.f32.mrb[6].mxu0 }
 0x831   : > { %v1609_v15 = vadd.f32 %v1608_v11, %v1535_v14  ;;  %v3960_v16 = vpop.f32.mrb[7].mxu0  ;;  %v3818_v14 = vld [vmem:[#allocation19] ss:$0 sm:$0xff] }
 0x834   : > { %v1686_v17 = vpop.f32.mrb[8].mxu0 }
 0x835   : > { %v1690_v18 = vmul.f32 0.35355338, %v1686_v17  ;;  %v3970_v19 = vpop.f32.mrb[9].mxu0 }
 0x837   : > { %v1691_v20 = vsel %vm1210_vm5, -1e+09, %v1690_v18 }
 0x838   : > { %v1692_v21 = vsel %vm1134_vm4, %v1691_v20, -inf }
 0x839   : > { %1693 = vmax.xlane.f32.xlu1 %v1692_v21 }
 0x84a   : > { %1703 = vrot.lane.b32.xlu1 %v5582_v31, %s4941_s22  ;;  %s6063_s22 = smov 72  }
 0x84e   : > { %1853 = vrot.lane.b32.xlu1 %v5582_v31, %s5989_s17  ;;  %s6066_s17 = sld [smem:[#allocation40_spill]] }
 0x854   : > { %p6069_p1 = scmp.ne.s32.totalorder %s6066_s17, 0 }
 0x8c6   : > { %v1694_v22 = vpop.xlane.xlu1 %1693 }
 0x8c7   : > { %v1695_v23 = vsub.f32 %v1691_v20, %v1694_v22 }
 0x8c9   : > { %v1696_v24 = vmul.f32 1.442695, %v1695_v23 }
 0x8ca   : > { %v1704_v25 = vpop.permute.xlu1 %1703 }
 0x8cb   : > { %4354 = vpow2.f32 %v1696_v24  ;;  %3972 = vmatpush3.msra.mxu1 %v1704_v25 }
 0x8cc   : > { %3981 = vmatprep.subr.mxu1 %v4933_v13 }
 0x8ce   : > { %v1854_v33 = vpop.permute.xlu1 %1853 }
 0x8d5   : > { %v4355_v26 = vpop.eup %4354 }
 0x8d6   : > { %v1698_v27 = vsel %vm1134_vm4, %v4355_v26, 0.0 }
 0x8d7   : > { %1699 = vadd.xlane.f32.xlu0 %v1698_v27 }
 0x8ed   : > { %1855 = vrot.lane.b32.xlu0 %v5582_v31, %s5987_s14  ;;  %s4818_s14 = sshll.u32 %s4945_s27, 4  ;;  %s4819_s14 = int_to_ptr.vmem [resolvable:$false] %s4818_s14 }
 0x8ee   : > { %p4821_p8 = scmp.lt.s32.totalorder %s5883_s0, %s4819_s14 }
 0x964   : > { %v1700_v28 = vpop.xlane.xlu0 %1699 }
 0x965   : > { %4356 = vrcp.f32 %v1700_v28 }
 0x968   : > { %v1856_v32 = vpop.permute.xlu0 %1855 }
 0x96f   : > { %v4357_v29 = vpop.eup %4356 }
 0x970   : > { %v1702_v30 = vmul.f32 %v4357_v29, %v4355_v26  ;;  %v1001_v26 = vld [vmem:[%s858_s7] sm:$0xff]  ;;  %s6064_s7 = sld [smem:[#allocation58_spill]] }
 0x972   : > { %3974 = vmatmul.mubr.msk.f32.vlgmr.msra.gmra.mrb[6].mxu1 %vm1134_vm4, %v1702_v30 }
 0x973   : > { %3982 = vmatpush3.xpose.msk.msra.mxu1 %vm1134_vm4, %v1856_v32  ;;  %3983 = vmatprep.mubr.msk.f32.mxu1 %vm4932_vm1, %v4933_v13 }
 0x974   : > { %3991 = vmatprep.subr.mxu1 %v4933_v13 }
 0x976   : > { %3984 = vmatmul.mubr.msk.f32.vlgmr.msra.gmra.mrb[8].mxu1 %vm1134_vm4, %v1854_v33  ;;  %v3816_v33 = vld [vmem:[#allocation16] ss:$0 sm:$0xff] }
 0x977   : > { %3993 = vmatprep.mubr.msk.f32.mxu1 %vm4932_vm1, %v4933_v13  ;;  %3992 = vmatpush3.msra.mxu1 %v1130_v48 }
 0x978   : > { %4120 = vmatprep.subr.bf16.mxu1 %v4931_v10 }
 0xa45   : > { %v1775_v35 = vpop.f32.mrb[6].mxu1 }
 0xa46   : > { %v3975_v37 = vpop.f32.mrb[7].mxu1  ;;  %3979 = vmatmul.mubr.msk.f32.vlgmr.msra.gmra.mrb[10].mxu0 %vm1134_vm4, %v1775_v35 }
 0xa47   : > { %3988 = vmatprep.mubr.msk.f32.mxu0 %vm4932_vm1, %v4933_v13  ;;  %v3817_v37 = vld [vmem:[#allocation17] ss:$0 sm:$0xff] }
 0xa49   : > { %v1927_v38 = vpop.f32.mrb[8].mxu1 }
 0xa4a   : > { %v1931_v39 = vmul.f32 0.35355338, %v1927_v38  ;;  %v3985_v40 = vpop.f32.mrb[9].mxu1 }
 0xa4c   : > { %v1932_v41 = vsel %vm1210_vm5, -1e+09, %v1931_v39 }
 0xa4d   : > { %v1933_v42 = vsel %vm1134_vm4, %v1932_v41, -inf }
 0xa4e   : > { %1934 = vmax.xlane.f32.xlu1 %v1933_v42 }
 0xadb   : > { %v1935_v43 = vpop.xlane.xlu1 %1934 }
 0xadc   : > { %v1936_v44 = vsub.f32 %v1932_v41, %v1935_v43 }
 0xade   : > { %v1937_v45 = vmul.f32 1.442695, %v1936_v44 }
 0xae0   : > { %4358 = vpow2.f32 %v1937_v45 }
 0xaea   : > { %v4359_v46 = vpop.eup %4358 }
 0xaeb   : > { %v1939_v47 = vsel %vm1134_vm4, %v4359_v46, 0.0 }
 0xaec   : > { %1940 = vadd.xlane.f32.xlu0 %v1939_v47 }
 0xb02   : > { %1944 = vrot.lane.b32.xlu0 %v5582_v31, %s4944_s8  ;;  %s3845_s8 = sshll.u32 %s5092_s6, 7  ;;  %s4814_s6 = scalar_lea.vmem %s5883_s0, 128 }
 0xb03   : > { %p4815_p0 = scmp.ne.s32.totalorder %s5883_s0, %s4814_s6 }
 0xb05   : > { %p4816_p11 = pnand %p4815_p0, %p6069_p1 }
 0xb07   : > { %p4817_p9 = pneg %p4816_p11 }
 0xb19   : > { %v1848_v36 = vpop.f32.mrb[10].mxu0 }
 0xb1a   : > { %v1852_v49 = vadd.f32 %v1848_v36, %v1609_v15  ;;  %v3980_v50 = vpop.f32.mrb[11].mxu0  ;;  %v5744_v36 = vld [vmem:[%s867_s28] sm:$0xff] }
 0xb1b   : > { %vm2396_vm8 = vcmp.eq.f32.partialorder %v5744_v36, 0.0 }
 0xb79   : > { %v1941_v51 = vpop.xlane.xlu0 %1940 }
 0xb7a   : > { %4360 = vrcp.f32 %v1941_v51 }
 0xb7d   : > { %v1945_v52 = vpop.permute.xlu0 %1944 }
 0xb7e   : > { %3987 = vmatpush3.msra.mxu0 %v1945_v52 }
 0xb7f   : > { %4114 = vmatprep.subr.bf16.mxu0 %v4931_v10 }
 0xb84   : > { %v4361_v53 = vpop.eup %4360 }
 0xb85   : > { %v1943_v54 = vmul.f32 %v4361_v53, %v4359_v46 }
 0xb87   : > { %3989 = vmatmul.mubr.msk.f32.vlgmr.msra.gmra.mrb[12].mxu0 %vm1134_vm4, %v1943_v54 }
 0xb88   : > { %4004 = vmatprep.mubr.msk.f32.mxu0 %vm4932_vm1, %v4933_v13  ;;  %4116 = vmatpush3.bf16.msra.mxu0 %v4115_v3 }
 0xb89   : > { %4117 = vmatprep.subr.bf16.mxu0 %v4931_v10 }
 0xc5a   : > { %v2016_v31 = vpop.f32.mrb[12].mxu0 }
 0xc5b   : > { %v3990_v55 = vpop.f32.mrb[13].mxu0  ;;  %3994 = vmatmul.mubr.msk.f32.vlgmr.msra.gmra.mrb[10].mxu1 %vm1134_vm4, %v2016_v31 }
 0xc5c   : > { %4015 = vmatprep.mubr.msk.f32.mxu1 %vm4932_vm1, %v4933_v13 }
 0xd2e   : > { %v2089_v56 = vpop.f32.mrb[10].mxu1 }
 0xd2f   : > { %v2093_v58 = vadd.f32 %v2089_v56, %v1852_v49  ;;  %v3995_v59 = vpop.f32.mrb[11].mxu1 }
 0xd31   : > { %v2101_v60 = vadd.f32 %v3815_v57, %v2093_v58 }
 0xd33   : > { %v5689_v61 = vadd.f32 %v2101_v60, %v5553_v0  ;;  %v2141_v0 = vld [vmem:[%s6059_s19 + $0x10] sm:$0xff] }
 0xd34   : > { %v4337_v5 = vpack.i.bf16 %v2142_v4, %v2141_v0  ;;  %v4118_v6 = vpack.c.bf16 %v2142_v4, %v2141_v0 }
 0xd35   : > { %v2103_v62 = vsel %vm1004_vm0, %v5689_v61, 0.0 }
 0xd36   : > { %2104 = vadd.xlane.f32.xlu1 %v2103_v62  ;;  %4338 = vrot.lane.b32.xlu0 %v4337_v5, %s4935_s9 }
 0xd37   : > { %4119 = vmatpush3.bf16.msra.mxu0 %v4118_v6 }
 0xd38   : > { %4018 = vmatprep.subr.mxu0 %v4933_v13 }
 0xd3a   : > { %2239 = vrot.lane.b32.xlu0 %v3818_v14, %s4935_s9 }
 0xda8   : > { %v4339_v17 = vpop.permute.xlu0 %4338 }
 0xda9   : > { %v4341_v21 = vunpack.i.h.bf16 %v4339_v17  ;;  %v4340_v22 = vunpack.i.l.bf16 %v4339_v17 }
 0xdab   : > { %v4124_v24 = vpack.c.bf16 %v4341_v21, %v4340_v22 }
 0xdac   : > { %v2240_v40 = vpop.permute.xlu0 %2239 }
 0xdc3   : > { %v2105_v7 = vpop.xlane.xlu1 %2104 }
 0xdc4   : > { %v2106_v8 = vmul.f32 0.03125, %v2105_v7 }
 0xdc6   : > { %v2107_v9 = vsub.f32 %v5689_v61, %v2106_v8 }
 0xdc8   : > { %v2108_v11 = vmul.f32 %v2107_v9, %v2107_v9  ;;  %v2127_v34 = vmul.f32 %v3816_v33, %v2107_v9 }
 0xdca   : > { %v2109_v12 = vsel %vm1004_vm0, %v2108_v11, 0.0 }
 0xdcb   : > { %2110 = vadd.xlane.f32.xlu1 %v2109_v12 }
 0xddc   : > { %4333 = vrot.lane.b32.xlu1 %v4332_v2, %s4935_s9 }
 0xe58   : > { %v2111_v15 = vpop.xlane.xlu1 %2110 }
 0xe59   : > { %v2112_v16 = vmul.f32 0.032258064, %v2111_v15 }
 0xe5b   : > { %4362 = vrsqrt.f32 %v2112_v16  ;;  %vm2115_vm6 = vcmp.eq.f32.partialorder %v2112_v16, inf  ;;  %v2118_v28 = vand.u32 2147483648, %v2112_v16  ;;  %vm2117_vm7 = vcmp.eq.f32.partialorder %v2112_v16, 0.0 }
 0xe5c   : > { %v4334_v18 = vpop.permute.xlu1 %4333 }
 0xe5d   : > { %v4336_v19 = vunpack.i.h.bf16 %v4334_v18  ;;  %v4335_v20 = vunpack.i.l.bf16 %v4334_v18 }
 0xe5f   : > { %v4121_v23 = vpack.c.bf16 %v4336_v19, %v4335_v20 }
 0xe61   : > { %4122 = vmatpush3.bf16.msra.mxu1 %v4121_v23 }
 0xe62   : > { %4123 = vmatprep.subr.bf16.mxu1 %v4931_v10 }
 0xe65   : > { %v4363_v25 = vpop.eup %4362  ;;  %4125 = vmatpush3.bf16.msra.mxu1 %v4124_v24 }
 0xe66   : > { %v2114_v27 = vmul.f32 %v4363_v25, %v2112_v16  ;;  %4023 = vmatprep.subr.mxu1 %v4933_v13 }
 0xe68   : > { %v2116_v29 = vsel %vm2115_vm6, %v2112_v16, %v2114_v27  ;;  %4016 = vmatmul.mubr.msk.f32.vlgmr.msra.gmra.mrb[12].mxu1 %vm1004_vm0, %v1001_v26 }
 0xe69   : > { %v2119_v30 = vsel %vm2117_vm7, %v2118_v28, %v2116_v29  ;;  %4025 = vmatprep.mubr.msk.f32.mxu1 %vm4932_vm1, %v4933_v13 }
 0xe6a   : > { %v2128_v32 = vadd.f32 1e-06, %v2119_v30 }
 0xe6c   : > { %4364 = vrcp.f32 %v2128_v32 }
 0xe76   : > { %v4365_v35 = vpop.eup %4364 }
 0xe77   : > { %v2130_v38 = vmul.f32 %v4365_v35, %v2127_v34 }
 0xe79   : > { %v2138_v39 = vadd.f32 %v3817_v37, %v2130_v38 }
 0xe7b   : > { %4005 = vmatmul.mubr.msk.f32.vlgmr.msra.gmra.mrb[14].mxu0 %vm1004_vm0, %v2138_v39 }
 0xe7c   : > { %4020 = vmatprep.mubr.msk.f32.mxu0 %vm4932_vm1, %v4933_v13 }
 0xf3b   : > { %v2311_v41 = vpop.f32.mrb[12].mxu1 }
 0xf3c   : > { %v5722_v42 = vadd.f32 %v2311_v41, %v2240_v40  ;;  %v4017_v43 = vpop.f32.mrb[13].mxu1 }
 0xf3e   : > { %2487 = vrot.lane.b32.xlu1 %v5722_v42, %s4934_s4  ;;  %4019 = vmatpush3.xpose.msk.msra.mxu0 %vm1134_vm4, %v5722_v42 }
 0xf3f   : > { %4028 = vmatprep.subr.mxu0 %v4933_v13 }
 0xf4e   : > { %v2219_v44 = vpop.f32.mrb[14].mxu0 }
 0xf4f   : > { %v5729_v45 = vadd.f32 %v3818_v14, %v2219_v44  ;;  %v4006_v46 = vpop.f32.mrb[15].mxu0 }
 0xf51   : > { %2485 = vrot.lane.b32.xlu0 %v5729_v45, %s4934_s4  ;;  %4021 = vmatmul.mubr.msk.f32.vlgmr.msra.gmra.mrb[16].mxu0 %vm1134_vm4, %v5729_v45  ;;  %s6060_s4 = sld [smem:[#allocation54_spill]] }
 0xf52   : > { %4030 = vmatprep.mubr.msk.f32.mxu0 %vm4932_vm1, %v4933_v13 }
 0xf57   : > { %v2316_v9 = vld [vmem:[%s6060_s4 + $0x8] sm:$0xff]  ;;  %v2315_v16 = vld [vmem:[%s6060_s4] sm:$0xff]  ;;  %v2318_v36 = vld [vmem:[%s6060_s4 + $0x18] sm:$0xff] }
 0xfb0   : > { %v2488_v47 = vpop.permute.xlu1 %2487 }
 0xfb1   : > { %4029 = vmatpush3.xpose.msk.msra.mxu0 %vm1134_vm4, %v2488_v47  ;;  %v2317_v47 = vld [vmem:[%s6060_s4 + $0x10] sm:$0xff] }
 0xfb2   : > { %4038 = vmatprep.subr.mxu0 %v4933_v13 }
 0xfc3   : > { %v2486_v48 = vpop.permute.xlu0 %2485 }
 0xfc4   : > { %4031 = vmatmul.mubr.msk.f32.vlgmr.msra.gmra.mrb[18].mxu0 %vm1134_vm4, %v2486_v48 }
 0xfc5   : > { %4040 = vmatprep.mubr.msk.f32.mxu0 %vm4932_vm1, %v4933_v13  ;;  %4039 = vmatpush3.msra.mxu0 %v2316_v9 }
 0xfc6   : > { %4048 = vmatprep.subr.mxu0 %v4933_v13 }
0x1024   : > { %v2391_v49 = vpop.f32.mrb[16].mxu0 }
0x1025   : > { %v2395_v50 = vmul.f32 0.35355338, %v2391_v49  ;;  %v4022_v51 = vpop.f32.mrb[17].mxu0 }
0x1027   : > { %v2397_v52 = vsel %vm2396_vm8, -1e+09, %v2395_v50 }
0x1028   : > { %v2398_v53 = vsel %vm1134_vm4, %v2397_v52, -inf }
0x1029   : > { %2399 = vmax.xlane.f32.xlu1 %v2398_v53 }
0x1097   : > { %v2559_v54 = vpop.f32.mrb[18].mxu0 }
0x1098   : > { %v2563_v31 = vmul.f32 0.35355338, %v2559_v54  ;;  %v4032_v55 = vpop.f32.mrb[19].mxu0 }
0x109a   : > { %v2564_v56 = vsel %vm2396_vm8, -1e+09, %v2563_v31 }
0x109b   : > { %v2565_v57 = vsel %vm1134_vm4, %v2564_v56, -inf }
0x109c   : > { %2566 = vmax.xlane.f32.xlu0 %v2565_v57 }
0x10b6   : > { %v2400_v58 = vpop.xlane.xlu1 %2399 }
0x10b7   : > { %v2401_v59 = vsub.f32 %v2397_v52, %v2400_v58 }
0x10b9   : > { %v2402_v60 = vmul.f32 1.442695, %v2401_v59 }
0x10bb   : > { %4366 = vpow2.f32 %v2402_v60 }
0x10c5   : > { %v4367_v62 = vpop.eup %4366 }
0x10c6   : > { %v2404_v63 = vsel %vm1134_vm4, %v4367_v62, 0.0 }
0x10c7   : > { %2405 = vadd.xlane.f32.xlu0 %v2404_v63 }
0x10dd   : > { %2409 = vrot.lane.b32.xlu0 %v5722_v42, %s4935_s9 }
0x10e1   : > { %2798 = vrot.lane.b32.xlu0 %v5729_v45, %s4940_s1 }
0x1129   : > { %v2567_v1 = vpop.xlane.xlu0 %2566 }
0x112a   : > { %v2568_v2 = vsub.f32 %v2564_v56, %v2567_v1 }
0x112c   : > { %v2569_v3 = vmul.f32 1.442695, %v2568_v2 }
0x112e   : > { %4368 = vpow2.f32 %v2569_v3 }
0x1138   : > { %v4369_v0 = vpop.eup %4368 }
0x1139   : > { %v2571_v4 = vsel %vm1134_vm4, %v4369_v0, 0.0 }
0x113a   : > { %2572 = vadd.xlane.f32.xlu1 %v2571_v4 }
0x114b   : > { %2576 = vrot.lane.b32.xlu1 %v5722_v42, %s4936_s2  ;;  %s6068_s2 = sld [smem:[#allocation60_spill]] }
0x114f   : > { %2800 = vrot.lane.b32.xlu1 %v5722_v42, %s4940_s1  ;;  %s6062_s1 = smov 80  }
0x1154   : > { %v2406_v5 = vpop.xlane.xlu0 %2405 }
0x1155   : > { %4370 = vrcp.f32 %v2406_v5  ;;  %v3837_v5 = vld [vmem:[#allocation20] ss:$0 sm:$0xff] }
0x1158   : > { %v2410_v6 = vpop.permute.xlu0 %2409 }
0x1159   : > { %4024 = vmatpush3.msra.mxu1 %v2410_v6 }
0x115a   : > { %4033 = vmatprep.subr.mxu1 %v4933_v13 }
0x115c   : > { %v2799_v22 = vpop.permute.xlu0 %2798 }
0x115f   : > { %v4371_v7 = vpop.eup %4370 }
0x1160   : > { %v2408_v8 = vmul.f32 %v4371_v7, %v4367_v62 }
0x1162   : > { %4026 = vmatmul.mubr.msk.f32.vlgmr.msra.gmra.mrb[14].mxu1 %vm1134_vm4, %v2408_v8 }
0x1163   : > { %4035 = vmatprep.mubr.msk.f32.mxu1 %vm4932_vm1, %v4933_v13 }
0x11c7   : > { %v2573_v11 = vpop.xlane.xlu1 %2572 }
0x11c8   : > { %4372 = vrcp.f32 %v2573_v11 }
0x11cb   : > { %v2577_v12 = vpop.permute.xlu1 %2576 }
0x11cc   : > { %4034 = vmatpush3.msra.mxu1 %v2577_v12 }
0x11cd   : > { %4043 = vmatprep.subr.mxu1 %v4933_v13 }
0x11cf   : > { %v2801_v20 = vpop.permute.xlu1 %2800 }
0x11d2   : > { %v4373_v14 = vpop.eup %4372 }
0x11d3   : > { %v2575_v15 = vmul.f32 %v4373_v14, %v4369_v0 }
0x11d5   : > { %4036 = vmatmul.mubr.msk.f32.vlgmr.msra.gmra.mrb[16].mxu1 %vm1134_vm4, %v2575_v15 }
0x11d6   : > { %4044 = vmatpush3.msra.mxu1 %v2315_v16  ;;  %4045 = vmatprep.mubr.msk.f32.mxu1 %vm4932_vm1, %v4933_v13 }
0x11d7   : > { %4053 = vmatprep.subr.mxu1 %v4933_v13 }
0x1235   : > { %v2481_v17 = vpop.f32.mrb[14].mxu1 }
0x1236   : > { %v4027_v18 = vpop.f32.mrb[15].mxu1  ;;  %4046 = vmatmul.mubr.msk.f32.vlgmr.msra.gmra.mrb[18].mxu1 %vm1134_vm4, %v2481_v17 }
0x1237   : > { %4055 = vmatprep.mubr.msk.f32.mxu1 %vm4932_vm1, %v4933_v13  ;;  %v3326_v18 = vld [vmem:[#allocation25 + $0x8] sm:$0xff] }
0x12a8   : > { %v2648_v19 = vpop.f32.mrb[16].mxu1 }
0x12a9   : > { %v4037_v21 = vpop.f32.mrb[17].mxu1  ;;  %4041 = vmatmul.mubr.msk.f32.vlgmr.msra.gmra.mrb[20].mxu0 %vm1134_vm4, %v2648_v19  ;;  %v3327_v19 = vld [vmem:[#allocation25 + $0x10] sm:$0xff] }
0x12aa   : > { %4049 = vmatpush3.xpose.msk.msra.mxu0 %vm1134_vm4, %v2801_v20  ;;  %4050 = vmatprep.mubr.msk.f32.mxu0 %vm4932_vm1, %v4933_v13  ;;  %v3328_v21 = vld [vmem:[#allocation25 + $0x18] sm:$0xff] }
0x12ab   : > { %4058 = vmatprep.subr.mxu0 %v4933_v13 }
0x12ad   : > { %4051 = vmatmul.mubr.msk.f32.vlgmr.msra.gmra.mrb[22].mxu0 %vm1134_vm4, %v2799_v22  ;;  %v3410_v22 = vld [vmem:[%s6064_s7] sm:$0xff] }
0x12ae   : > { %4060 = vmatprep.mubr.msk.f32.mxu0 %vm4932_vm1, %v4933_v13  ;;  %4059 = vmatpush3.msra.mxu0 %v2317_v47 }
0x12af   : > { %4068 = vmatprep.subr.mxu0 %v4933_v13 }
0x1309   : > { %v2794_v23 = vpop.f32.mrb[18].mxu1 }
0x130a   : > { %v4047_v24 = vpop.f32.mrb[19].mxu1 }
0x130b   : > { %v3412_v24 = vld [vmem:[%s6064_s7 + $0x10] sm:$0xff] }
0x137c   : > { %v2721_v25 = vpop.f32.mrb[20].mxu0 }
0x137d   : > { %v2795_v26 = vadd.f32 %v2794_v23, %v2721_v25  ;;  %v4042_v27 = vpop.f32.mrb[21].mxu0  ;;  %v3411_v23 = vld [vmem:[%s6064_s7 + $0x8] sm:$0xff] }
0x137e   : > { %v4133_v25 = vpack.c.bf16 %v3411_v23, %v3410_v22 }
0x1380   : > { %v2872_v28 = vpop.f32.mrb[22].mxu0 }
0x1381   : > { %v2876_v29 = vmul.f32 0.35355338, %v2872_v28  ;;  %v4052_v30 = vpop.f32.mrb[23].mxu0  ;;  %v3414_v28 = vld [vmem:[%s6064_s7 + $0x20] sm:$0xff] }
0x1383   : > { %v2877_v32 = vsel %vm2396_vm8, -1e+09, %v2876_v29  ;;  %v3415_v29 = vld [vmem:[%s6064_s7 + $0x28] sm:$0xff] }
0x1384   : > { %v2878_v33 = vsel %vm1134_vm4, %v2877_v32, -inf  ;;  %v4139_v30 = vpack.c.bf16 %v3415_v29, %v3414_v28 }
0x1385   : > { %2879 = vmax.xlane.f32.xlu1 %v2878_v33 }
0x1396   : > { %3041 = vrot.lane.b32.xlu1 %v5722_v42, %s6061_s15 }
0x139a   : > { %3039 = vrot.lane.b32.xlu1 %v5729_v45, %s6061_s15  ;;  %s5881_s15 = scalar_lea.hbm %s6068_s2, %s3845_s8 }
0x1412   : > { %v2880_v34 = vpop.xlane.xlu1 %2879 }
0x1413   : > { %v2881_v35 = vsub.f32 %v2877_v32, %v2880_v34 }
0x1415   : > { %v2882_v37 = vmul.f32 1.442695, %v2881_v35 }
0x1416   : > { %v3042_v44 = vpop.permute.xlu1 %3041 }
0x1417   : > { %4374 = vpow2.f32 %v2882_v37 }
0x141a   : > { %v3040_v46 = vpop.permute.xlu1 %3039 }
0x1421   : > { %v4375_v38 = vpop.eup %4374 }
0x1422   : > { %v2884_v39 = vsel %vm1134_vm4, %v4375_v38, 0.0 }
0x1423   : > { %2885 = vadd.xlane.f32.xlu0 %v2884_v39 }
0x1439   : > { %2889 = vrot.lane.b32.xlu0 %v5722_v42, %s6062_s1  ;;  %s6065_s1 = sld [smem:[#allocation57_spill]] }
0x14b0   : > { %v2886_v40 = vpop.xlane.xlu0 %2885 }
0x14b1   : > { %4376 = vrcp.f32 %v2886_v40 }
0x14b4   : > { %v2890_v41 = vpop.permute.xlu0 %2889 }
0x14b5   : > { %4054 = vmatpush3.msra.mxu1 %v2890_v41  ;;  %v3838_v41 = vld [vmem:[#allocation22] ss:$0 sm:$0xff] }
0x14b6   : > { %4063 = vmatprep.subr.mxu1 %v4933_v13 }
0x14bb   : > { %v4377_v43 = vpop.eup %4376 }
0x14bc   : > { %v2888_v45 = vmul.f32 %v4377_v43, %v4375_v38 }
0x14be   : > { %4056 = vmatmul.mubr.msk.f32.vlgmr.msra.gmra.mrb[20].mxu1 %vm1134_vm4, %v2888_v45  ;;  %v3839_v45 = vld [vmem:[#allocation23] ss:$0 sm:$0xff] }
0x14bf   : > { %4064 = vmatpush3.xpose.msk.msra.mxu1 %vm1134_vm4, %v3042_v44  ;;  %4065 = vmatprep.mubr.msk.f32.mxu1 %vm4932_vm1, %v4933_v13 }
0x14c0   : > { %4073 = vmatprep.subr.mxu1 %v4933_v13 }
0x14c2   : > { %4066 = vmatmul.mubr.msk.f32.vlgmr.msra.gmra.mrb[22].mxu1 %vm1134_vm4, %v3040_v46 }
0x14c3   : > { %4075 = vmatprep.mubr.msk.f32.mxu1 %vm4932_vm1, %v4933_v13  ;;  %4074 = vmatpush3.msra.mxu1 %v2318_v36 }
0x14c4   : > { %4132 = vmatprep.subr.bf16.mxu1 %v4931_v10 }
0x1591   : > { %v2961_v48 = vpop.f32.mrb[20].mxu1 }
0x1592   : > { %v4057_v49 = vpop.f32.mrb[21].mxu1  ;;  %4061 = vmatmul.mubr.msk.f32.vlgmr.msra.gmra.mrb[24].mxu0 %vm1134_vm4, %v2961_v48  ;;  %v3417_v48 = vld [vmem:[%s6064_s7 + $0x38] sm:$0xff] }
0x1593   : > { %4070 = vmatprep.mubr.msk.f32.mxu0 %vm4932_vm1, %v4933_v13 }
0x1595   : > { %v3113_v50 = vpop.f32.mrb[22].mxu1 }
0x1596   : > { %v3117_v51 = vmul.f32 0.35355338, %v3113_v50  ;;  %v4067_v52 = vpop.f32.mrb[23].mxu1  ;;  %v3840_v50 = vld [vmem:[%s6065_s1] ss:$0 sm:$0xff]  ;;  %s3503_s1 = scalar_lea.sflag [#allocation4], %s5506_s25 }
0x1598   : > { %v3118_v53 = vsel %vm2396_vm8, -1e+09, %v3117_v51 }
0x1599   : > { %v3119_v54 = vsel %vm1134_vm4, %v3118_v53, -inf }
0x159a   : > { %3120 = vmax.xlane.f32.xlu0 %v3119_v54 }
0x15b0   : > { %3130 = vrot.lane.b32.xlu0 %v5722_v42, %s6063_s22  ;;  %s4820_s22 = scalar_lea.vmem %s4819_s14, 256 }
0x15b1   : > { %p4822_p7 = scmp.lt.s32.totalorder %s4820_s22, %s4814_s6 }
0x15b3   : > { %p4823_p4 = por %p4822_p7, %p4821_p8 }
0x15b5   : > { %p4824_p12 = pnand %p4823_p4, %p4817_p9 }
0x1627   : > { %v3121_v31 = vpop.xlane.xlu0 %3120 }
0x1628   : > { %v3122_v55 = vsub.f32 %v3118_v53, %v3121_v31 }
0x162a   : > { %v3123_v56 = vmul.f32 1.442695, %v3122_v55  ;;  %v3843_v55 = vld [vmem:[%s6067_s21] ss:$0 sm:$0xff] }
0x162b   : > { %v3131_v57 = vpop.permute.xlu0 %3130 }
0x162c   : > { %4378 = vpow2.f32 %v3123_v56  ;;  %4069 = vmatpush3.msra.mxu0 %v3131_v57 }
0x162d   : > { %4126 = vmatprep.subr.bf16.mxu0 %v4931_v10 }
0x1636   : > { %v4379_v58 = vpop.eup %4378 }
0x1637   : > { %v3125_v59 = vsel %vm1134_vm4, %v4379_v58, 0.0 }
0x1638   : > { %3126 = vadd.xlane.f32.xlu1 %v3125_v59 }
0x1665   : > { %v3034_v42 = vpop.f32.mrb[24].mxu0 }
0x1666   : > { %v3038_v60 = vadd.f32 %v3034_v42, %v2795_v26  ;;  %v4062_v62 = vpop.f32.mrb[25].mxu0  ;;  %v3413_v26 = vld [vmem:[%s6064_s7 + $0x18] sm:$0xff] }
0x1667   : > { %v4136_v27 = vpack.c.bf16 %v3413_v26, %v3412_v24 }
0x16c5   : > { %v3127_v63 = vpop.xlane.xlu1 %3126 }
0x16c6   : > { %4380 = vrcp.f32 %v3127_v63 }
0x16d0   : > { %v4381_v1 = vpop.eup %4380 }
0x16d1   : > { %v3129_v2 = vmul.f32 %v4381_v1, %v4379_v58 }
0x16d3   : > { %4071 = vmatmul.mubr.msk.f32.vlgmr.msra.gmra.mrb[26].mxu0 %vm1134_vm4, %v3129_v2 }
0x16d4   : > { %4086 = vmatprep.mubr.msk.f32.mxu0 %vm4932_vm1, %v4933_v13 }
0x17a6   : > { %v3202_v3 = vpop.f32.mrb[26].mxu0 }
0x17a7   : > { %v4072_v0 = vpop.f32.mrb[27].mxu0  ;;  %4076 = vmatmul.mubr.msk.f32.vlgmr.msra.gmra.mrb[24].mxu1 %vm1134_vm4, %v3202_v3 }
0x17a8   : > { %4105 = vmatprep.mubr.msk.f32.mxu1 %vm4932_vm1, %v4933_v13  ;;  %v3325_v13 = vld [vmem:[#allocation25] sm:$0xff]  ;;  %4134 = vmatpush3.bf16.msra.mxu1 %v4133_v25 }
0x17a9   : > { %v4127_v20 = vpack.c.bf16 %v3326_v18, %v3325_v13  ;;  %4135 = vmatprep.subr.bf16.mxu1 %v4931_v10 }
0x17ab   : > { %4128 = vmatpush3.bf16.msra.mxu0 %v4127_v20 }
0x17ac   : > { %4129 = vmatprep.subr.bf16.mxu0 %v4931_v10  ;;  %4137 = vmatpush3.bf16.msra.mxu1 %v4136_v27 }
0x17ad   : > { %4138 = vmatprep.subr.bf16.mxu1 %v4931_v10 }
0x17b0   : > { %4140 = vmatpush3.bf16.msra.mxu1 %v4139_v30 }
0x17b1   : > { %4141 = vmatprep.subr.bf16.mxu1 %v4931_v10  ;;  %v3416_v10 = vld [vmem:[%s6064_s7 + $0x30] sm:$0xff] }
0x17b2   : > { %v4142_v49 = vpack.c.bf16 %v3417_v48, %v3416_v10 }
0x17b4   : > { %4143 = vmatpush3.bf16.msra.mxu1 %v4142_v49 }
0x187a   : > { %v3275_v4 = vpop.f32.mrb[24].mxu1 }
0x187b   : > { %v3279_v6 = vadd.f32 %v3275_v4, %v3038_v60  ;;  %v4077_v7 = vpop.f32.mrb[25].mxu1 }
0x187d   : > { %v3287_v8 = vadd.f32 %v3837_v5, %v3279_v6 }
0x187f   : > { %v5834_v9 = vadd.f32 %v3287_v8, %v5689_v61  ;;  %v4130_v61 = vpack.c.bf16 %v3328_v21, %v3327_v19 }
0x1881   : > { %v3289_v11 = vsel %vm1004_vm0, %v5834_v9, 0.0  ;;  %4131 = vmatpush3.bf16.msra.mxu0 %v4130_v61 }
0x1882   : > { %3290 = vadd.xlane.f32.xlu1 %v3289_v11 }
0x190f   : > { %v3291_v12 = vpop.xlane.xlu1 %3290 }
0x1910   : > { %v3292_v14 = vmul.f32 0.03125, %v3291_v12 }
0x1912   : > { %v3293_v15 = vsub.f32 %v5834_v9, %v3292_v14 }
0x1914   : > { %v3294_v16 = vmul.f32 %v3293_v15, %v3293_v15  ;;  %v3313_v43 = vmul.f32 %v3838_v41, %v3293_v15 }
0x1916   : > { %v3295_v17 = vsel %vm1004_vm0, %v3294_v16, 0.0 }
0x1917   : > { %3296 = vadd.xlane.f32.xlu1 %v3295_v17 }
0x19a4   : > { %v3297_v32 = vpop.xlane.xlu1 %3296 }
0x19a5   : > { %v3298_v33 = vmul.f32 0.032258064, %v3297_v32 }
0x19a7   : > { %4382 = vrsqrt.f32 %v3298_v33  ;;  %vm3301_vm9 = vcmp.eq.f32.partialorder %v3298_v33, inf  ;;  %v3304_v37 = vand.u32 2147483648, %v3298_v33  ;;  %vm3303_vm10 = vcmp.eq.f32.partialorder %v3298_v33, 0.0 }
0x19b1   : > { %v4383_v34 = vpop.eup %4382 }
0x19b2   : > { %v3300_v35 = vmul.f32 %v4383_v34, %v3298_v33 }
0x19b4   : > { %v3302_v38 = vsel %vm3301_vm9, %v3298_v33, %v3300_v35 }
0x19b5   : > { %v3305_v39 = vsel %vm3303_vm10, %v3304_v37, %v3302_v38 }
0x19b6   : > { %v3314_v40 = vadd.f32 1e-06, %v3305_v39 }
0x19b8   : > { %4384 = vrcp.f32 %v3314_v40 }
0x19c2   : > { %v4385_v44 = vpop.eup %4384 }
0x19c3   : > { %v3316_v46 = vmul.f32 %v4385_v44, %v3313_v43 }
0x19c5   : > { %v3324_v47 = vadd.f32 %v3839_v45, %v3316_v46 }
0x19c7   : > { %4087 = vmatmul.mubr.msk.f32.vlgmr.msra.gmra.mrb[28].mxu0 %vm1004_vm0, %v3324_v47 }
0x1a9a   : > { %v3405_v51 = vpop.f32.mrb[28].mxu0 }
0x1a9b   : > { %v3406_v52 = vadd.f32 %v3840_v50, %v3405_v51  ;;  %v4088_v53 = vpop.f32.mrb[29].mxu0 }
0x1a9d   : > { %v3409_v54 = vmax.f32 %v3406_v52, 0.0 }
0x1a9f   : > { %4106 = vmatmul.mubr.msk.f32.vlgmr.msra.gmra.mrb[26].mxu1 %vm3418_vm11, %v3409_v54 }
0x1b72   : > { %v3488_v31 = vpop.f32.mrb[26].mxu1 }
0x1b73   : > { %v3492_v56 = vadd.f32 %v3488_v31, %v5834_v9  ;;  %v4107_v57 = vpop.f32.mrb[27].mxu1 }
0x1b75   : > { %v3500_v58 = vadd.f32 %v3843_v55, %v3492_v56 }
0x1b77   : > { %3501 = vst.msk [vmem:[%s999_s24] sm:$0xff] %vm1004_vm0, %v3500_v58 }
0x1b78   : > { %4827 = shalt.err (!%p4824_p12)
}
0x1b79   : > { %s4828_s25 = scalar_lea.hbm %s5881_s15, 128  ;;  %s4832_s24 = scalar_lea.hbm %s6068_s2, 256 }
0x1b7a   : > { %p4829_p13 = scmp.ne.s32.totalorder %s5881_s15, %s4828_s25  ;;  %p4833_p2 = scmp.lt.u32.totalorder %s5881_s15, %s6068_s2 }
0x1b7b   : > { %p4834_p3 = scmp.lt.u32.totalorder %s4832_s24, %s4828_s25  ;;  %p4836_p0 = scmp.lt.u32.totalorder %s4828_s25, %s5881_s15 }
0x1b7c   : > { %p4830_p10 = pnand %p4829_p13, %p6069_p1 }
0x1b7d   : > { %p4835_p5 = por %p4834_p3, %p4833_p2 }
0x1b7e   : > { %p4831_p6 = pneg %p4830_p10 }
0x1b7f   : > { %p4837_p11 = por %p4836_p0, %p4835_p5 }
0x1b81   : > { %p4838_p9 = pnand %p4837_p11, %p4831_p6 }
0x1b83   : > { %4841 = shalt.err (!%p4838_p9)
}
0x1b84   : > { %4196 = dma.vmem_to_hbm [thread:$0]  (%p6069_p1), %s5883_s0, 128, %s5881_s15, %s3503_s1  }
0x1b85 PF: > { %s6070_s6 = sld [smem:[#allocation37_spill]]  ;;  %s6071_s27 = sld [smem:[#allocation41_spill]] }
0x1b86   : > { %p6073_p7 = scmp.ge.s32.totalorder %s4912_s26, 2 }
0x1b8b   : > { %s3528_s14 = sand.u32 1, %s6070_s6   ;;  %p6072_p8 = scmp.ne.s32.totalorder %s6071_s27, 0 }
0x1b8c   : > { %s3529_s22 = scalar_lea.sflag [#allocation4], %s3528_s14 }
0x1b8d   : > { %p4246_p4 = pnand %p6073_p7, %p6072_p8 }
0x1b8f   : > { %4895 = dma.done.wait (!%p4246_p4), %s3529_s22, 128  }
0x1b90   : > { %4897 = vsyncadd (!%p4246_p4), %s3529_s22, 4294967168  ;;  %s6074_s26 = sld [smem:[#allocation38_spill]]  ;;  %s6075_s25 = sld [smem:[#allocation39_spill]] }
0x1b91   : > { %s6076_s22 = smov %s4904_s5  ;;  %s6077_s5 = smov %s4908_s23 }
0x1b96   : > { %p48_p12 = scmp.ge.s32.totalorder %s6074_s26, 4   ;;  %s6078_s23 = smov %s6075_s25 }
0x1b98   :  { %50 = sbr.rel (!%p48_p12) target bundleno = 34 (0x22), region = 242 }
0x1b9f   :  { %3534 = vsyncpa [#allocation3], 1 }
0x1ba0   :  { %3536 = vsyncpa [#allocation3 + $0x1], 1 }
0x1ba1   :  { %3537 = vsyncpa [#allocation6], 1 }
0x1ba2   :  { %3539 = vsyncpa [#allocation6 + $0x1], 1 }
0x1ba3   :  { %3540 = vsyncpa [#allocation9], 1 }
0x1ba4   :  { %3542 = vsyncpa [#allocation9 + $0x1], 1 }
0x1ba5   :  { %3543 = vsyncpa [#allocation12], 1 }
0x1ba6   :  { %3544 = vsyncpa [#allocation15], 1 }
0x1ba7   :  { %3545 = vsyncpa [#allocation18], 1 }
0x1ba8   :  { %3546 = vsyncpa [#allocation21], 1 }
0x1ba9   :  { %3547 = vsyncpa [#allocation24], 1 }
0x1baa   :  { %3548 = vsyncpa [#allocation4], 1 }
0x1bab   :  { %3550 = vsyncpa [#allocation4 + $0x1], 1 }

</bundles_post_ra>
